<compile_context>
chip_gen: v6e
topology: v6e:2x2x1
jax: 0.10.0
libtpu: 0.0.40
codegen_flags: <defaults>
</compile_context>

<pallas_src>
import functools

import numpy as np
import jax
import jax.numpy as jnp
from jax.experimental import pallas as pl
from jax.experimental.pallas import tpu as pltpu


NEG_INF = -1e9
VOCAB_PAD = 128   # lane-dense store width for the logits head
SLAB_W = 128      # lane width of both weight slabs

CFG = dict(
    enc_vocab_size=40,
    embedding_size=16,     # ELECTRA embedding_size != dec hidden_size
    enc_hidden=32,
    enc_heads=2,
    enc_layers=1,
    enc_ffn=64,
    dec_hidden=32,
    dec_heads=2,
    dec_layers=1,
    dec_ffn=64,
    trg_vocab_size=24,
    max_pos=16,
    padding_idx=0,
)


# ----------------------------------------------------------------------------
# Static slab layout (shared by the host packer and the kernel trace).
# Every 2-D weight occupies rows [off, off+r) and lanes [0, c) of the weight
# slab; every 1-D bias / LN param occupies one 128-lane row of the vector slab.
# ----------------------------------------------------------------------------
def _layout(c):
    E, H, DH = c["embedding_size"], c["enc_hidden"], c["dec_hidden"]

    w_items = [("enc_proj_w", E, H), ("emb_proj_w", E, DH)]
    for l in range(c["enc_layers"]):
        w_items += [(f"enc{l}_qkv_w", H, 3 * H),           # fused Q|K|V
                    (f"enc{l}_o_w", H, H),
                    (f"enc{l}_f1_w", H, c["enc_ffn"]),
                    (f"enc{l}_f2_w", c["enc_ffn"], H)]
    for l in range(c["dec_layers"]):
        w_items += [(f"dec{l}_sqkv_w", DH, 3 * DH),         # fused Q|K|V
                    (f"dec{l}_so_w", DH, DH),
                    (f"dec{l}_cq_w", DH, DH),
                    (f"dec{l}_ckv_w", H, 2 * DH),           # fused K|V (from enc)
                    (f"dec{l}_co_w", DH, DH),
                    (f"dec{l}_f1_w", DH, c["dec_ffn"]),
                    (f"dec{l}_f2_w", c["dec_ffn"], DH)]
    w_items.append(("dense_w", DH, VOCAB_PAD))

    w_off, off = {}, 0
    for name, r, cl in w_items:
        assert cl <= SLAB_W, f"{name}: {cl} lanes > slab width"
        w_off[name] = (off, r, cl)
        off += -(-r // 8) * 8          # keep every block sublane-aligned

    v_items = [("enc_emb_ln_g", E), ("enc_emb_ln_b", E),
               ("enc_proj_b", H), ("emb_proj_b", DH)]
    for l in range(c["enc_layers"]):
        v_items += [(f"enc{l}_qkv_b", 3 * H), (f"enc{l}_o_b", H),
                    (f"enc{l}_ln1_g", H), (f"enc{l}_ln1_b", H),
                    (f"enc{l}_f1_b", c["enc_ffn"]), (f"enc{l}_f2_b", H),
                    (f"enc{l}_ln2_g", H), (f"enc{l}_ln2_b", H)]
    for l in range(c["dec_layers"]):
        v_items += [(f"dec{l}_sqkv_b", 3 * DH), (f"dec{l}_so_b", DH),
                    (f"dec{l}_ln1_g", DH), (f"dec{l}_ln1_b", DH),
                    (f"dec{l}_cq_b", DH), (f"dec{l}_ckv_b", 2 * DH),
                    (f"dec{l}_co_b", DH),
                    (f"dec{l}_ln2_g", DH), (f"dec{l}_ln2_b", DH),
                    (f"dec{l}_f1_b", c["dec_ffn"]), (f"dec{l}_f2_b", DH),
                    (f"dec{l}_ln3_g", DH), (f"dec{l}_ln3_b", DH)]
    v_items.append(("dense_b", VOCAB_PAD))
    for name, n in v_items:
        assert n <= SLAB_W, f"{name}: {n} lanes > slab width"
    v_off = {name: (i, n) for i, (name, n) in enumerate(v_items)}
    return w_off, off, v_off, len(v_items)


# ----------------------------------------------------------------------------
# Shared forward math.  `W(name)` / `V(name)` return the weight / (1,n) bias
# for `name`; `recip(x)` is 1/x (approx EUP reciprocal inside the kernel).
# Used both by the Pallas kernel (on refs) and by the pure-JAX reference.
# ----------------------------------------------------------------------------
def _forward_math(W, V, enc_emb, enc_pos, dec_emb, dec_pos, enc_kb, dec_kb,
                  *, n_enc, n_dec, enc_heads, dec_heads, eps, recip):
    B, Se, E = enc_emb.shape
    _, Sd, _ = dec_emb.shape
    DH = dec_pos.shape[-1]

    def mm(x, wname, bname):
        return jnp.dot(x, W(wname), preferred_element_type=jnp.float32) + V(bname)

    def ln(x, gname, bname):
        # one-pass stats: the two cross-lane reductions are independent
        n = x.shape[-1]
        mean = jnp.sum(x, axis=-1, keepdims=True) * (1.0 / n)
        meansq = jnp.sum(x * x, axis=-1, keepdims=True) * (1.0 / n)
        var = meansq - mean * mean
        return (x - mean) * jax.lax.rsqrt(var + eps) * V(gname) + V(bname)

    def gelu(x):
        # TODO(synk): HF ELECTRA uses exact erf GELU; tanh approximation is
        # kept for robust Mosaic lowering (tiny numerical difference).
        return jax.nn.gelu(x, approximate=True)

    def sdpa(q2, k2, v2, bias, nh, b, sq, sk):
        # batched multi-head attention; per-head slices are 16-lane intra-vreg
        d = q2.shape[-1]
        dh = d // nh
        scale = 1.0 / float(dh) ** 0.5
        q3 = q2.reshape(b, sq, d)
        k3 = k2.reshape(b, sk, d)
        v3 = v2.reshape(b, sk, d)
        ctxs = []
        for h in range(nh):                       # static unroll, heads=2
            sl = slice(h * dh, (h + 1) * dh)
            s = jnp.einsum("bqd,bkd->bqk", q3[..., sl], k3[..., sl],
                           preferred_element_type=jnp.float32) * scale
            if bias is not None:
                s = s + bias
            m = jnp.max(s, axis=-1, keepdims=True)
            p = jnp.exp(s - m)
            inv = recip(jnp.sum(p, axis=-1, keepdims=True))   # EUP in kernel
            ctx = jnp.einsum("bqk,bkd->bqd", p, v3[..., sl],
                             preferred_element_type=jnp.float32) * inv
            ctxs.append(ctx.reshape(b * sq, dh))
        full = ctxs[0] if nh == 1 else jnp.concatenate(ctxs, axis=-1)
        return full                                # (b*sq, d): one full Wo dot next

    def self_attn(x2, pfx, bias, nh, b, s):
        d = x2.shape[-1]
        qkv = mm(x2, pfx + "qkv_w", pfx + "qkv_b")         # fused Q|K|V
        ctx = sdpa(qkv[:, :d], qkv[:, d:2 * d], qkv[:, 2 * d:3 * d],
                   bias, nh, b, s, s)
        return mm(ctx, pfx + "o_w", pfx + "o_b")

    def cross_attn(x2, enc2, l, bias, nh, b, sq, sk):
        d = x2.shape[-1]
        q = mm(x2, f"dec{l}_cq_w", f"dec{l}_cq_b")
        kv = mm(enc2, f"dec{l}_ckv_w", f"dec{l}_ckv_b")    # fused K|V
        ctx = sdpa(q, kv[:, :d], kv[:, d:2 * d], bias, nh, b, sq, sk)
        return mm(ctx, f"dec{l}_co_w", f"dec{l}_co_b")

    # ---------------- ELECTRA encoder (attention_mask=None -> no bias) -------
    x2 = (enc_emb + enc_pos[None]).reshape(B * Se, E)
    x2 = ln(x2, "enc_emb_ln_g", "enc_emb_ln_b")
    h2 = mm(x2, "enc_proj_w", "enc_proj_b")
    for l in range(n_enc):
        a = self_attn(h2, f"enc{l}_", None, enc_heads, B, Se)
        h2 = ln(h2 + a, f"enc{l}_ln1_g", f"enc{l}_ln1_b")
        f = mm(gelu(mm(h2, f"enc{l}_f1_w", f"enc{l}_f1_b")),
               f"enc{l}_f2_w", f"enc{l}_f2_b")
        h2 = ln(h2 + f, f"enc{l}_ln2_g", f"enc{l}_ln2_b")
    enc2 = h2                                               # (B*Se, H)

    # ---------------- decoder ------------------------------------------------
    d2 = mm(dec_emb.reshape(B * Sd, E), "emb_proj_w", "emb_proj_b")
    d2 = (d2.reshape(B, Sd, DH) + dec_pos[None]).reshape(B * Sd, DH)

    row = jax.lax.broadcasted_iota(jnp.int32, (Sd, Sd), 0)
    col = jax.lax.broadcasted_iota(jnp.int32, (Sd, Sd), 1)
    causal = jnp.where(col <= row, 0.0, NEG_INF)            # (Sd, Sd)
    self_bias = causal[None, :, :] + dec_kb                 # (B, Sd, Sd)
    cross_bias = enc_kb                                     # (B, 1, Se)

    for l in range(n_dec):
        sa = self_attn(d2, f"dec{l}_s", self_bias, dec_heads, B, Sd)
        d2 = ln(d2 + sa, f"dec{l}_ln1_g", f"dec{l}_ln1_b")
        ca = cross_attn(d2, enc2, l, cross_bias, dec_heads, B, Sd, Se)
        d2 = ln(d2 + ca, f"dec{l}_ln2_g", f"dec{l}_ln2_b")
        f = mm(gelu(mm(d2, f"dec{l}_f1_w", f"dec{l}_f1_b")),
               f"dec{l}_f2_w", f"dec{l}_f2_b")
        d2 = ln(d2 + f, f"dec{l}_ln3_g", f"dec{l}_ln3_b")

    logits = mm(d2, "dense_w", "dense_b")                   # (B*Sd, VOCAB_PAD)
    return logits.reshape(B, Sd, VOCAB_PAD)


# ----------------------------------------------------------------------------
# The fused kernel: all weights resident in VMEM (two slabs), single grid step.
# ----------------------------------------------------------------------------
def _fused_p2s_kernel(enc_emb_ref, enc_pos_ref, dec_emb_ref, dec_pos_ref,
                      enc_kb_ref, dec_kb_ref, w_ref, b_ref, out_ref,
                      *, w_off, v_off, n_enc, n_dec, enc_heads, dec_heads, eps):
    def W(name):                       # static sub-window of the weight slab
        off, r, c = w_off[name]
        return w_ref[off:off + r, :c]

    def V(name):                       # (1, n) row of the vector slab
        row, n = v_off[name]
        return b_ref[row:row + 1, :n]

    logits = _forward_math(
        W, V, enc_emb_ref[...], enc_pos_ref[...], dec_emb_ref[...],
        dec_pos_ref[...], enc_kb_ref[...], dec_kb_ref[...],
        n_enc=n_enc, n_dec=n_dec, enc_heads=enc_heads, dec_heads=dec_heads,
        eps=eps, recip=lambda x: pl.reciprocal(x, approx=True))
    out_ref[...] = logits.astype(out_ref.dtype)


# ----------------------------------------------------------------------------
# Parameter init (synthetic; mirrors the module's tensors) + host-side packing
# ----------------------------------------------------------------------------
def _param_init(key_iter, shape, scale=0.02):
    return scale * jax.random.normal(next(key_iter), shape, dtype=jnp.float32)


def init_params(seed=0):
    keys = iter(jax.random.split(jax.random.PRNGKey(seed), 256))
    c = CFG
    H, E, DH = c["enc_hidden"], c["embedding_size"], c["dec_hidden"]

    def attn_block(dim_q, dim_kv, dim):
        return dict(
            wq=_param_init(keys, (dim_q, dim)), bq=jnp.zeros((dim,)),
            wk=_param_init(keys, (dim_kv, dim)), bk=jnp.zeros((dim,)),
            wv=_param_init(keys, (dim_kv, dim)), bv=jnp.zeros((dim,)),
            wo=_param_init(keys, (dim, dim)), bo=jnp.zeros((dim,)),
        )

    params = dict(
        word_emb=_param_init(keys, (c["enc_vocab_size"], E)),
        enc_pos_emb=_param_init(keys, (c["max_pos"], E)),
        enc_emb_ln_g=jnp.ones((E,)), enc_emb_ln_b=jnp.zeros((E,)),
        enc_proj_w=_param_init(keys, (E, H)), enc_proj_b=jnp.zeros((H,)),
        emb_proj_w=_param_init(keys, (E, DH)), emb_proj_b=jnp.zeros((DH,)),
        dec_pos_emb=_param_init(keys, (c["max_pos"], DH)),
        dense_w=_param_init(keys, (DH, c["trg_vocab_size"])),
        dense_b=jnp.zeros((c["trg_vocab_size"],)),
        enc_layers=[], dec_layers=[],
    )
    for _ in range(c["enc_layers"]):
        params["enc_layers"].append(dict(
            attn=attn_block(H, H, H),
            ln1_g=jnp.ones((H,)), ln1_b=jnp.zeros((H,)),
            ffn_w1=_param_init(keys, (H, c["enc_ffn"])),
            ffn_b1=jnp.zeros((c["enc_ffn"],)),
            ffn_w2=_param_init(keys, (c["enc_ffn"], H)),
            ffn_b2=jnp.zeros((H,)),
            ln2_g=jnp.ones((H,)), ln2_b=jnp.zeros((H,)),
        ))
    for _ in range(c["dec_layers"]):
        params["dec_layers"].append(dict(
            self_attn=attn_block(DH, DH, DH),
            ln1_g=jnp.ones((DH,)), ln1_b=jnp.zeros((DH,)),
            cross_attn=attn_block(DH, H, DH),
            ln2_g=jnp.ones((DH,)), ln2_b=jnp.zeros((DH,)),
            ffn_w1=_param_init(keys, (DH, c["dec_ffn"])),
            ffn_b1=jnp.zeros((c["dec_ffn"],)),
            ffn_w2=_param_init(keys, (c["dec_ffn"], DH)),
            ffn_b2=jnp.zeros((DH,)),
            ln3_g=jnp.ones((DH,)), ln3_b=jnp.zeros((DH,)),
        ))
    return params


def pack_params(params):
    """One-time host-side packing into two contiguous f32 slabs (outside jit)."""
    c = CFG
    w_off, w_rows, v_off, n_vec = _layout(c)

    def npf(a):
        return np.asarray(a, np.float32)

    def cat1(*arrs):
        return np.concatenate([npf(a) for a in arrs], axis=1)

    w_data = {"enc_proj_w": npf(params["enc_proj_w"]),
              "emb_proj_w": npf(params["emb_proj_w"])}
    v_data = {"enc_emb_ln_g": params["enc_emb_ln_g"],
              "enc_emb_ln_b": params["enc_emb_ln_b"],
              "enc_proj_b": params["enc_proj_b"],
              "emb_proj_b": params["emb_proj_b"]}
    for l, lyr in enumerate(params["enc_layers"]):
        at = lyr["attn"]
        w_data[f"enc{l}_qkv_w"] = cat1(at["wq"], at["wk"], at["wv"])
        w_data[f"enc{l}_o_w"] = npf(at["wo"])
        w_data[f"enc{l}_f1_w"] = npf(lyr["ffn_w1"])
        w_data[f"enc{l}_f2_w"] = npf(lyr["ffn_w2"])
        v_data[f"enc{l}_qkv_b"] = np.concatenate([npf(at["bq"]), npf(at["bk"]), npf(at["bv"])])
        v_data[f"enc{l}_o_b"] = at["bo"]
        v_data[f"enc{l}_ln1_g"] = lyr["ln1_g"]; v_data[f"enc{l}_ln1_b"] = lyr["ln1_b"]
        v_data[f"enc{l}_f1_b"] = lyr["ffn_b1"]; v_data[f"enc{l}_f2_b"] = lyr["ffn_b2"]
        v_data[f"enc{l}_ln2_g"] = lyr["ln2_g"]; v_data[f"enc{l}_ln2_b"] = lyr["ln2_b"]
    for l, lyr in enumerate(params["dec_layers"]):
        sa, ca = lyr["self_attn"], lyr["cross_attn"]
        w_data[f"dec{l}_sqkv_w"] = cat1(sa["wq"], sa["wk"], sa["wv"])
        w_data[f"dec{l}_so_w"] = npf(sa["wo"])
        w_data[f"dec{l}_cq_w"] = npf(ca["wq"])
        w_data[f"dec{l}_ckv_w"] = cat1(ca["wk"], ca["wv"])
        w_data[f"dec{l}_co_w"] = npf(ca["wo"])
        w_data[f"dec{l}_f1_w"] = npf(lyr["ffn_w1"])
        w_data[f"dec{l}_f2_w"] = npf(lyr["ffn_w2"])
        v_data[f"dec{l}_sqkv_b"] = np.concatenate([npf(sa["bq"]), npf(sa["bk"]), npf(sa["bv"])])
        v_data[f"dec{l}_so_b"] = sa["bo"]
        v_data[f"dec{l}_ln1_g"] = lyr["ln1_g"]; v_data[f"dec{l}_ln1_b"] = lyr["ln1_b"]
        v_data[f"dec{l}_cq_b"] = ca["bq"]
        v_data[f"dec{l}_ckv_b"] = np.concatenate([npf(ca["bk"]), npf(ca["bv"])])
        v_data[f"dec{l}_co_b"] = ca["bo"]
        v_data[f"dec{l}_ln2_g"] = lyr["ln2_g"]; v_data[f"dec{l}_ln2_b"] = lyr["ln2_b"]
        v_data[f"dec{l}_f1_b"] = lyr["ffn_b1"]; v_data[f"dec{l}_f2_b"] = lyr["ffn_b2"]
        v_data[f"dec{l}_ln3_g"] = lyr["ln3_g"]; v_data[f"dec{l}_ln3_b"] = lyr["ln3_b"]

    # vocab head padded to 128 lanes ONCE here (not per forward call)
    dense_pad = np.zeros((c["dec_hidden"], VOCAB_PAD), np.float32)
    dense_pad[:, :c["trg_vocab_size"]] = npf(params["dense_w"])
    w_data["dense_w"] = dense_pad
    dense_b_pad = np.zeros((VOCAB_PAD,), np.float32)
    dense_b_pad[:c["trg_vocab_size"]] = npf(params["dense_b"])
    v_data["dense_b"] = dense_b_pad

    w_slab = np.zeros((w_rows, SLAB_W), np.float32)
    for name, (off, r, cl) in w_off.items():
        blk = w_data[name]
        assert blk.shape == (r, cl), f"{name}: {blk.shape} != {(r, cl)}"
        w_slab[off:off + r, :cl] = blk
    b_slab = np.zeros((n_vec, SLAB_W), np.float32)
    for name, (row, n) in v_off.items():
        vec = npf(v_data[name])
        assert vec.shape == (n,), f"{name}: {vec.shape} != {(n,)}"
        b_slab[row, :n] = vec

    return dict(w_slab=jnp.asarray(w_slab), b_slab=jnp.asarray(b_slab),
                word_emb=params["word_emb"],
                enc_pos_emb=params["enc_pos_emb"],
                dec_pos_emb=params["dec_pos_emb"])


# ----------------------------------------------------------------------------
# Forward pass (mirrors Pronunciation2Spelling.forward) -- one pallas_call
# ----------------------------------------------------------------------------
def pronunciation2spelling_forward(packed, enc_ids, dec_ids):
    c = CFG
    B, Se = enc_ids.shape
    _, Sd = dec_ids.shape
    Vt = c["trg_vocab_size"]
    w_off, _, v_off, _ = _layout(c)          # static Python ints (trace time)

    # Embedding gathers + tiny mask prep stay in JAX (glue); everything else is
    # chained inside the fused kernel.
    enc_emb = packed["word_emb"][enc_ids]                         # (B, Se, E)
    dec_emb = packed["word_emb"][dec_ids]                         # (B, Sd, E)
    enc_pos = packed["enc_pos_emb"][:Se]                          # (Se, E)
    dec_pos = packed["dec_pos_emb"][:Sd]                          # (Sd, DH)
    enc_kb = jnp.where(enc_ids == c["padding_idx"], NEG_INF,
                       0.0).astype(jnp.float32)[:, None, :]       # (B, 1, Se)
    dec_kb = jnp.where(dec_ids == c["padding_idx"], NEG_INF,
                       0.0).astype(jnp.float32)[:, None, :]       # (B, 1, Sd)

    kernel = functools.partial(
        _fused_p2s_kernel, w_off=w_off, v_off=v_off,
        n_enc=c["enc_layers"], n_dec=c["dec_layers"],
        enc_heads=c["enc_heads"], dec_heads=c["dec_heads"], eps=1e-12)

    args = [enc_emb, enc_pos, dec_emb, dec_pos, enc_kb, dec_kb,
            packed["w_slab"], packed["b_slab"]]

    def full(a):  # whole-array block (single grid step, batch folded in)
        nd = a.ndim
        return pl.BlockSpec(a.shape, lambda i, nd=nd: (0,) * nd)

    # TODO(synk): on v7x a CORE_PARALLEL batch grid axis could split B across
    # the two TensorCores; at these toy shapes batch-folding wins, so grid=(1,).
    logits_pad = pl.pallas_call(
        kernel,
        out_shape=jax.ShapeDtypeStruct((B, Sd, VOCAB_PAD), jnp.float32),
        grid=(1,),
        in_specs=[full(a) for a in args],
        out_specs=pl.BlockSpec((B, Sd, VOCAB_PAD), lambda i: (0, 0, 0)),
        compiler_params=pltpu.CompilerParams(
            dimension_semantics=("arbitrary",)),
    )(*args)

    return logits_pad[:, :, :Vt]                 # (B, Sd, trg_vocab_size)


# ----------------------------------------------------------------------------
# Pure-JAX reference (same math, exact reciprocal) for correctness checking
# ----------------------------------------------------------------------------
def _reference_forward(packed, enc_ids, dec_ids):
    c = CFG
    B, Se = enc_ids.shape
    _, Sd = dec_ids.shape
    w_off, _, v_off, _ = _layout(c)
    ws, bs = packed["w_slab"], packed["b_slab"]

    def W(name):
        off, r, cl = w_off[name]
        return ws[off:off + r, :cl]

    def V(name):
        row, n = v_off[name]
        return bs[row:row + 1, :n]

    enc_emb = packed["word_emb"][enc_ids]
    dec_emb = packed["word_emb"][dec_ids]
    enc_pos = packed["enc_pos_emb"][:Se]
    dec_pos = packed["dec_pos_emb"][:Sd]
    enc_kb = jnp.where(enc_ids == c["padding_idx"], NEG_INF,
                       0.0).astype(jnp.float32)[:, None, :]
    dec_kb = jnp.where(dec_ids == c["padding_idx"], NEG_INF,
                       0.0).astype(jnp.float32)[:, None, :]

    logits = _forward_math(W, V, enc_emb, enc_pos, dec_emb, dec_pos,
                           enc_kb, dec_kb,
                           n_enc=c["enc_layers"], n_dec=c["dec_layers"],
                           enc_heads=c["enc_heads"], dec_heads=c["dec_heads"],
                           eps=1e-12, recip=lambda x: 1.0 / x)
    return logits[:, :, :c["trg_vocab_size"]]


# TODO(synk): torch.load of the pretrained ELECTRA checkpoint has no Pallas /
# in-script equivalent; parameters are synthesized deterministically instead.
# TODO(synk): at production scale (H=256, vocab~30k, long seq, many layers) the
# all-weights-resident design must move to layer-streamed BlockSpecs (grid over
# layers, explicit vmem_limit_bytes) -- v7x's 64 MiB VMEM breaks it first.


if __name__ == "__main__":
    B, Se, Sd = 2, 8, 8
    key = jax.random.PRNGKey(0)
    k_enc, k_dec = jax.random.split(key)
    enc_ids = jax.random.randint(k_enc, (B, Se), 1, CFG["enc_vocab_size"])
    dec_ids = jax.random.randint(k_dec, (B, Sd), 1, CFG["enc_vocab_size"])
    # introduce some padding tokens to exercise the masks
    enc_ids = enc_ids.at[:, -2:].set(CFG["padding_idx"])
    dec_ids = dec_ids.at[:, -1:].set(CFG["padding_idx"])

    params = init_params(seed=0)
    packed = pack_params(params)           # one-time host-side slab packing

    fwd = jax.jit(pronunciation2spelling_forward)
    out = fwd(packed, enc_ids, dec_ids)
    jax.block_until_ready(out)
    assert out.shape == (B, Sd, CFG["trg_vocab_size"])
    assert bool(jnp.all(jnp.isfinite(out)))

    ref = jax.jit(_reference_forward)(packed, enc_ids, dec_ids)
    np.testing.assert_allclose(np.asarray(out), np.asarray(ref),
                               rtol=1e-2, atol=1e-2)
    print("KERNEL_OK")
</pallas_src>

<mosaic_0001>
module attributes {stable_mosaic.version = 11 : i64} {
  func.func @_fused_p2s_kernel(%arg0: i32, %arg1: memref<2x8x16xf32, #tpu.memory_space<vmem>>, %arg2: memref<8x16xf32, #tpu.memory_space<vmem>>, %arg3: memref<2x8x16xf32, #tpu.memory_space<vmem>>, %arg4: memref<8x32xf32, #tpu.memory_space<vmem>>, %arg5: memref<2x1x8xf32, #tpu.memory_space<vmem>>, %arg6: memref<2x1x8xf32, #tpu.memory_space<vmem>>, %arg7: memref<480x128xf32, #tpu.memory_space<vmem>>, %arg8: memref<26x128xf32, #tpu.memory_space<vmem>>, %arg9: memref<2x8x128xf32, #tpu.memory_space<vmem>>) attributes {dimension_semantics = [#tpu.dimension_semantics<arbitrary>], iteration_bounds = array<i64: 1>, scalar_prefetch = 0 : i64, scratch_operands = 0 : i64, tpu.core_type = #tpu.core_type<tc>, window_params = [{pipeline_mode = #tpu.pipeline_mode<synchronous>, transform_indices = @transform_0, window_bounds = array<i64: 2, 8, 16>}, {pipeline_mode = #tpu.pipeline_mode<synchronous>, transform_indices = @transform_1, window_bounds = array<i64: 8, 16>}, {pipeline_mode = #tpu.pipeline_mode<synchronous>, transform_indices = @transform_2, window_bounds = array<i64: 2, 8, 16>}, {pipeline_mode = #tpu.pipeline_mode<synchronous>, transform_indices = @transform_3, window_bounds = array<i64: 8, 32>}, {pipeline_mode = #tpu.pipeline_mode<synchronous>, transform_indices = @transform_4, window_bounds = array<i64: 2, 1, 8>}, {pipeline_mode = #tpu.pipeline_mode<synchronous>, transform_indices = @transform_5, window_bounds = array<i64: 2, 1, 8>}, {pipeline_mode = #tpu.pipeline_mode<synchronous>, transform_indices = @transform_6, window_bounds = array<i64: 480, 128>}, {pipeline_mode = #tpu.pipeline_mode<synchronous>, transform_indices = @transform_7, window_bounds = array<i64: 26, 128>}, {pipeline_mode = #tpu.pipeline_mode<synchronous>, transform_indices = @transform_8, window_bounds = array<i64: 2, 8, 128>}]} {
    %c0 = arith.constant 0 : index
    %c0_0 = arith.constant 0 : index
    %c0_1 = arith.constant 0 : index
    %0 = vector.load %arg1[%c0, %c0_0, %c0_1] : memref<2x8x16xf32, #tpu.memory_space<vmem>>, vector<2x8x16xf32>
    %c0_2 = arith.constant 0 : index
    %c0_3 = arith.constant 0 : index
    %1 = vector.load %arg2[%c0_2, %c0_3] : memref<8x16xf32, #tpu.memory_space<vmem>>, vector<8x16xf32>
    %c0_4 = arith.constant 0 : index
    %c0_5 = arith.constant 0 : index
    %c0_6 = arith.constant 0 : index
    %2 = vector.load %arg3[%c0_4, %c0_5, %c0_6] : memref<2x8x16xf32, #tpu.memory_space<vmem>>, vector<2x8x16xf32>
    %c0_7 = arith.constant 0 : index
    %c0_8 = arith.constant 0 : index
    %3 = vector.load %arg4[%c0_7, %c0_8] : memref<8x32xf32, #tpu.memory_space<vmem>>, vector<8x32xf32>
    %c0_9 = arith.constant 0 : index
    %c0_10 = arith.constant 0 : index
    %c0_11 = arith.constant 0 : index
    %4 = vector.load %arg5[%c0_9, %c0_10, %c0_11] : memref<2x1x8xf32, #tpu.memory_space<vmem>>, vector<2x1x8xf32>
    %c0_12 = arith.constant 0 : index
    %c0_13 = arith.constant 0 : index
    %c0_14 = arith.constant 0 : index
    %5 = vector.load %arg6[%c0_12, %c0_13, %c0_14] : memref<2x1x8xf32, #tpu.memory_space<vmem>>, vector<2x1x8xf32>
    %6 = vector.shape_cast %1 : vector<8x16xf32> to vector<1x8x16xf32>
    %7 = vector.broadcast %6 : vector<1x8x16xf32> to vector<2x8x16xf32>
    %8 = arith.addf %0, %7 : vector<2x8x16xf32>
    %9 = vector.shape_cast %8 : vector<2x8x16xf32> to vector<16x16xf32>
    %cst = arith.constant dense<0.000000e+00> : vector<16xf32>
    %10 = vector.multi_reduction <add>, %9, %cst [1] : vector<16x16xf32> to vector<16xf32>
    %11 = vector.shape_cast %10 : vector<16xf32> to vector<16x1xf32>
    %cst_15 = arith.constant 6.250000e-02 : f32
    %12 = vector.broadcast %cst_15 : f32 to vector<16x1xf32>
    %13 = arith.mulf %11, %12 : vector<16x1xf32>
    %14 = arith.mulf %9, %9 : vector<16x16xf32>
    %cst_16 = arith.constant dense<0.000000e+00> : vector<16xf32>
    %15 = vector.multi_reduction <add>, %14, %cst_16 [1] : vector<16x16xf32> to vector<16xf32>
    %16 = vector.shape_cast %15 : vector<16xf32> to vector<16x1xf32>
    %cst_17 = arith.constant 6.250000e-02 : f32
    %17 = vector.broadcast %cst_17 : f32 to vector<16x1xf32>
    %18 = arith.mulf %16, %17 : vector<16x1xf32>
    %19 = arith.mulf %13, %13 : vector<16x1xf32>
    %20 = arith.subf %18, %19 : vector<16x1xf32>
    %21 = vector.broadcast %13 : vector<16x1xf32> to vector<16x16xf32>
    %22 = arith.subf %9, %21 : vector<16x16xf32>
    %cst_18 = arith.constant 9.99999996E-13 : f32
    %23 = vector.broadcast %cst_18 : f32 to vector<16x1xf32>
    %24 = arith.addf %20, %23 : vector<16x1xf32>
    %25 = math.rsqrt %24 : vector<16x1xf32>
    %26 = vector.broadcast %25 : vector<16x1xf32> to vector<16x16xf32>
    %27 = arith.mulf %22, %26 : vector<16x16xf32>
    %c0_19 = arith.constant 0 : index
    %c0_20 = arith.constant 0 : index
    %28 = vector.load %arg8[%c0_19, %c0_20] : memref<26x128xf32, #tpu.memory_space<vmem>>, vector<1x16xf32>
    %29 = vector.broadcast %28 : vector<1x16xf32> to vector<16x16xf32>
    %30 = arith.mulf %27, %29 : vector<16x16xf32>
    %c1 = arith.constant 1 : index
    %c0_21 = arith.constant 0 : index
    %31 = vector.load %arg8[%c1, %c0_21] : memref<26x128xf32, #tpu.memory_space<vmem>>, vector<1x16xf32>
    %32 = vector.broadcast %31 : vector<1x16xf32> to vector<16x16xf32>
    %33 = arith.addf %30, %32 : vector<16x16xf32>
    %c0_22 = arith.constant 0 : index
    %c0_23 = arith.constant 0 : index
    %34 = vector.load %arg7[%c0_22, %c0_23] : memref<480x128xf32, #tpu.memory_space<vmem>>, vector<16x32xf32>
    %cst_24 = arith.constant dense<0.000000e+00> : vector<16x32xf32>
    %35 = tpu.matmul %33, %34, %cst_24 {dimension_numbers = #tpu.dot_dimension_numbers<[1], [0], [0], [1], [0, 0, 1, 1], [], []>} : vector<16x16xf32>, vector<16x32xf32>, vector<16x32xf32> -> vector<16x32xf32>
    %c2 = arith.constant 2 : index
    %c0_25 = arith.constant 0 : index
    %36 = vector.load %arg8[%c2, %c0_25] : memref<26x128xf32, #tpu.memory_space<vmem>>, vector<1x32xf32>
    %37 = vector.broadcast %36 : vector<1x32xf32> to vector<16x32xf32>
    %38 = arith.addf %35, %37 : vector<16x32xf32>
    %c32 = arith.constant 32 : index
    %c0_26 = arith.constant 0 : index
    %39 = vector.load %arg7[%c32, %c0_26] : memref<480x128xf32, #tpu.memory_space<vmem>>, vector<32x96xf32>
    %cst_27 = arith.constant dense<0.000000e+00> : vector<16x96xf32>
    %40 = tpu.matmul %38, %39, %cst_27 {dimension_numbers = #tpu.dot_dimension_numbers<[1], [0], [0], [1], [0, 0, 1, 1], [], []>} : vector<16x32xf32>, vector<32x96xf32>, vector<16x96xf32> -> vector<16x96xf32>
    %c4 = arith.constant 4 : index
    %c0_28 = arith.constant 0 : index
    %41 = vector.load %arg8[%c4, %c0_28] : memref<26x128xf32, #tpu.memory_space<vmem>>, vector<1x96xf32>
    %42 = vector.broadcast %41 : vector<1x96xf32> to vector<16x96xf32>
    %43 = arith.addf %40, %42 : vector<16x96xf32>
    %44 = vector.extract_strided_slice %43 {offsets = [0, 0], sizes = [16, 32], strides = [1, 1]} : vector<16x96xf32> to vector<16x32xf32>
    %45 = vector.extract_strided_slice %43 {offsets = [0, 32], sizes = [16, 32], strides = [1, 1]} : vector<16x96xf32> to vector<16x32xf32>
    %46 = vector.extract_strided_slice %43 {offsets = [0, 64], sizes = [16, 32], strides = [1, 1]} : vector<16x96xf32> to vector<16x32xf32>
    %47 = vector.shape_cast %44 : vector<16x32xf32> to vector<2x8x32xf32>
    %48 = vector.shape_cast %45 : vector<16x32xf32> to vector<2x8x32xf32>
    %49 = vector.shape_cast %46 : vector<16x32xf32> to vector<2x8x32xf32>
    %50 = vector.extract_strided_slice %47 {offsets = [0, 0, 0], sizes = [2, 8, 16], strides = [1, 1, 1]} : vector<2x8x32xf32> to vector<2x8x16xf32>
    %51 = vector.extract_strided_slice %48 {offsets = [0, 0, 0], sizes = [2, 8, 16], strides = [1, 1, 1]} : vector<2x8x32xf32> to vector<2x8x16xf32>
    "tpu.trace_start"() <{level = 10 : i32, message = "bqd,bkd->bqk"}> : () -> ()
    %cst_29 = arith.constant dense<0.000000e+00> : vector<2x8x8xf32>
    %52 = tpu.matmul %50, %51, %cst_29 {dimension_numbers = #tpu.dot_dimension_numbers<[2], [2], [1], [1], [0, 0, 0, 1, 1, 1], [0], [0]>} : vector<2x8x16xf32>, vector<2x8x16xf32>, vector<2x8x8xf32> -> vector<2x8x8xf32>
    "tpu.trace_stop"() : () -> ()
    %cst_30 = arith.constant 2.500000e-01 : f32
    %53 = vector.broadcast %cst_30 : f32 to vector<2x8x8xf32>
    %54 = arith.mulf %52, %53 : vector<2x8x8xf32>
    %cst_31 = arith.constant dense<0xFF800000> : vector<2x8xf32>
    %55 = vector.multi_reduction <maximumf>, %54, %cst_31 [2] : vector<2x8x8xf32> to vector<2x8xf32>
    %56 = vector.shape_cast %55 : vector<2x8xf32> to vector<2x8x1xf32>
    %57 = vector.broadcast %56 : vector<2x8x1xf32> to vector<2x8x8xf32>
    %58 = arith.subf %54, %57 : vector<2x8x8xf32>
    %59 = math.exp %58 : vector<2x8x8xf32>
    %cst_32 = arith.constant dense<0.000000e+00> : vector<2x8xf32>
    %60 = vector.multi_reduction <add>, %59, %cst_32 [2] : vector<2x8x8xf32> to vector<2x8xf32>
    %61 = vector.shape_cast %60 : vector<2x8xf32> to vector<2x8x1xf32>
    %62 = tpu.reciprocal %61 {approx = true} : vector<2x8x1xf32> -> vector<2x8x1xf32>
    %63 = vector.extract_strided_slice %49 {offsets = [0, 0, 0], sizes = [2, 8, 16], strides = [1, 1, 1]} : vector<2x8x32xf32> to vector<2x8x16xf32>
    "tpu.trace_start"() <{level = 10 : i32, message = "bqk,bkd->bqd"}> : () -> ()
    %cst_33 = arith.constant dense<0.000000e+00> : vector<2x8x16xf32>
    %64 = tpu.matmul %59, %63, %cst_33 {dimension_numbers = #tpu.dot_dimension_numbers<[2], [1], [1], [2], [0, 0, 0, 1, 1, 2], [0], [0]>} : vector<2x8x8xf32>, vector<2x8x16xf32>, vector<2x8x16xf32> -> vector<2x8x16xf32>
    "tpu.trace_stop"() : () -> ()
    %65 = vector.broadcast %62 : vector<2x8x1xf32> to vector<2x8x16xf32>
    %66 = arith.mulf %64, %65 : vector<2x8x16xf32>
    %67 = vector.shape_cast %66 : vector<2x8x16xf32> to vector<16x16xf32>
    %68 = vector.extract_strided_slice %47 {offsets = [0, 0, 16], sizes = [2, 8, 16], strides = [1, 1, 1]} : vector<2x8x32xf32> to vector<2x8x16xf32>
    %69 = vector.extract_strided_slice %48 {offsets = [0, 0, 16], sizes = [2, 8, 16], strides = [1, 1, 1]} : vector<2x8x32xf32> to vector<2x8x16xf32>
    "tpu.trace_start"() <{level = 10 : i32, message = "bqd,bkd->bqk"}> : () -> ()
    %cst_34 = arith.constant dense<0.000000e+00> : vector<2x8x8xf32>
    %70 = tpu.matmul %68, %69, %cst_34 {dimension_numbers = #tpu.dot_dimension_numbers<[2], [2], [1], [1], [0, 0, 0, 1, 1, 1], [0], [0]>} : vector<2x8x16xf32>, vector<2x8x16xf32>, vector<2x8x8xf32> -> vector<2x8x8xf32>
    "tpu.trace_stop"() : () -> ()
    %cst_35 = arith.constant 2.500000e-01 : f32
    %71 = vector.broadcast %cst_35 : f32 to vector<2x8x8xf32>
    %72 = arith.mulf %70, %71 : vector<2x8x8xf32>
    %cst_36 = arith.constant dense<0xFF800000> : vector<2x8xf32>
    %73 = vector.multi_reduction <maximumf>, %72, %cst_36 [2] : vector<2x8x8xf32> to vector<2x8xf32>
    %74 = vector.shape_cast %73 : vector<2x8xf32> to vector<2x8x1xf32>
    %75 = vector.broadcast %74 : vector<2x8x1xf32> to vector<2x8x8xf32>
    %76 = arith.subf %72, %75 : vector<2x8x8xf32>
    %77 = math.exp %76 : vector<2x8x8xf32>
    %cst_37 = arith.constant dense<0.000000e+00> : vector<2x8xf32>
    %78 = vector.multi_reduction <add>, %77, %cst_37 [2] : vector<2x8x8xf32> to vector<2x8xf32>
    %79 = vector.shape_cast %78 : vector<2x8xf32> to vector<2x8x1xf32>
    %80 = tpu.reciprocal %79 {approx = true} : vector<2x8x1xf32> -> vector<2x8x1xf32>
    %81 = vector.extract_strided_slice %49 {offsets = [0, 0, 16], sizes = [2, 8, 16], strides = [1, 1, 1]} : vector<2x8x32xf32> to vector<2x8x16xf32>
    "tpu.trace_start"() <{level = 10 : i32, message = "bqk,bkd->bqd"}> : () -> ()
    %cst_38 = arith.constant dense<0.000000e+00> : vector<2x8x16xf32>
    %82 = tpu.matmul %77, %81, %cst_38 {dimension_numbers = #tpu.dot_dimension_numbers<[2], [1], [1], [2], [0, 0, 0, 1, 1, 2], [0], [0]>} : vector<2x8x8xf32>, vector<2x8x16xf32>, vector<2x8x16xf32> -> vector<2x8x16xf32>
    "tpu.trace_stop"() : () -> ()
    %83 = vector.broadcast %80 : vector<2x8x1xf32> to vector<2x8x16xf32>
    %84 = arith.mulf %82, %83 : vector<2x8x16xf32>
    %85 = vector.shape_cast %84 : vector<2x8x16xf32> to vector<16x16xf32>
    %86 = tpu.concatenate %67, %85 in 1 : vector<16x16xf32>, vector<16x16xf32> -> vector<16x32xf32>
    %c64 = arith.constant 64 : index
    %c0_39 = arith.constant 0 : index
    %87 = vector.load %arg7[%c64, %c0_39] : memref<480x128xf32, #tpu.memory_space<vmem>>, vector<32x32xf32>
    %cst_40 = arith.constant dense<0.000000e+00> : vector<16x32xf32>
    %88 = tpu.matmul %86, %87, %cst_40 {dimension_numbers = #tpu.dot_dimension_numbers<[1], [0], [0], [1], [0, 0, 1, 1], [], []>} : vector<16x32xf32>, vector<32x32xf32>, vector<16x32xf32> -> vector<16x32xf32>
    %c5 = arith.constant 5 : index
    %c0_41 = arith.constant 0 : index
    %89 = vector.load %arg8[%c5, %c0_41] : memref<26x128xf32, #tpu.memory_space<vmem>>, vector<1x32xf32>
    %90 = vector.broadcast %89 : vector<1x32xf32> to vector<16x32xf32>
    %91 = arith.addf %88, %90 : vector<16x32xf32>
    %92 = arith.addf %38, %91 : vector<16x32xf32>
    %cst_42 = arith.constant dense<0.000000e+00> : vector<16xf32>
    %93 = vector.multi_reduction <add>, %92, %cst_42 [1] : vector<16x32xf32> to vector<16xf32>
    %94 = vector.shape_cast %93 : vector<16xf32> to vector<16x1xf32>
    %cst_43 = arith.constant 3.125000e-02 : f32
    %95 = vector.broadcast %cst_43 : f32 to vector<16x1xf32>
    %96 = arith.mulf %94, %95 : vector<16x1xf32>
    %97 = arith.mulf %92, %92 : vector<16x32xf32>
    %cst_44 = arith.constant dense<0.000000e+00> : vector<16xf32>
    %98 = vector.multi_reduction <add>, %97, %cst_44 [1] : vector<16x32xf32> to vector<16xf32>
    %99 = vector.shape_cast %98 : vector<16xf32> to vector<16x1xf32>
    %cst_45 = arith.constant 3.125000e-02 : f32
    %100 = vector.broadcast %cst_45 : f32 to vector<16x1xf32>
    %101 = arith.mulf %99, %100 : vector<16x1xf32>
    %102 = arith.mulf %96, %96 : vector<16x1xf32>
    %103 = arith.subf %101, %102 : vector<16x1xf32>
    %104 = vector.broadcast %96 : vector<16x1xf32> to vector<16x32xf32>
    %105 = arith.subf %92, %104 : vector<16x32xf32>
    %cst_46 = arith.constant 9.99999996E-13 : f32
    %106 = vector.broadcast %cst_46 : f32 to vector<16x1xf32>
    %107 = arith.addf %103, %106 : vector<16x1xf32>
    %108 = math.rsqrt %107 : vector<16x1xf32>
    %109 = vector.broadcast %108 : vector<16x1xf32> to vector<16x32xf32>
    %110 = arith.mulf %105, %109 : vector<16x32xf32>
    %c6 = arith.constant 6 : index
    %c0_47 = arith.constant 0 : index
    %111 = vector.load %arg8[%c6, %c0_47] : memref<26x128xf32, #tpu.memory_space<vmem>>, vector<1x32xf32>
    %112 = vector.broadcast %111 : vector<1x32xf32> to vector<16x32xf32>
    %113 = arith.mulf %110, %112 : vector<16x32xf32>
    %c7 = arith.constant 7 : index
    %c0_48 = arith.constant 0 : index
    %114 = vector.load %arg8[%c7, %c0_48] : memref<26x128xf32, #tpu.memory_space<vmem>>, vector<1x32xf32>
    %115 = vector.broadcast %114 : vector<1x32xf32> to vector<16x32xf32>
    %116 = arith.addf %113, %115 : vector<16x32xf32>
    %c96 = arith.constant 96 : index
    %c0_49 = arith.constant 0 : index
    %117 = vector.load %arg7[%c96, %c0_49] : memref<480x128xf32, #tpu.memory_space<vmem>>, vector<32x64xf32>
    %cst_50 = arith.constant dense<0.000000e+00> : vector<16x64xf32>
    %118 = tpu.matmul %116, %117, %cst_50 {dimension_numbers = #tpu.dot_dimension_numbers<[1], [0], [0], [1], [0, 0, 1, 1], [], []>} : vector<16x32xf32>, vector<32x64xf32>, vector<16x64xf32> -> vector<16x64xf32>
    %c8 = arith.constant 8 : index
    %c0_51 = arith.constant 0 : index
    %119 = vector.load %arg8[%c8, %c0_51] : memref<26x128xf32, #tpu.memory_space<vmem>>, vector<1x64xf32>
    %120 = vector.broadcast %119 : vector<1x64xf32> to vector<16x64xf32>
    %121 = arith.addf %118, %120 : vector<16x64xf32>
    %122 = arith.mulf %121, %121 : vector<16x64xf32>
    %123 = arith.mulf %121, %122 : vector<16x64xf32>
    %cst_52 = arith.constant 4.471500e-02 : f32
    %124 = vector.broadcast %cst_52 : f32 to vector<16x64xf32>
    %125 = arith.mulf %124, %123 : vector<16x64xf32>
    %126 = arith.addf %121, %125 : vector<16x64xf32>
    %cst_53 = arith.constant 0.797884583 : f32
    %127 = vector.broadcast %cst_53 : f32 to vector<16x64xf32>
    %128 = arith.mulf %127, %126 : vector<16x64xf32>
    %129 = math.tanh %128 : vector<16x64xf32>
    %cst_54 = arith.constant 1.000000e+00 : f32
    %130 = vector.broadcast %cst_54 : f32 to vector<16x64xf32>
    %131 = arith.addf %130, %129 : vector<16x64xf32>
    %cst_55 = arith.constant 5.000000e-01 : f32
    %132 = vector.broadcast %cst_55 : f32 to vector<16x64xf32>
    %133 = arith.mulf %132, %131 : vector<16x64xf32>
    %134 = arith.mulf %121, %133 : vector<16x64xf32>
    %c128 = arith.constant 128 : index
    %c0_56 = arith.constant 0 : index
    %135 = vector.load %arg7[%c128, %c0_56] : memref<480x128xf32, #tpu.memory_space<vmem>>, vector<64x32xf32>
    %cst_57 = arith.constant dense<0.000000e+00> : vector<16x32xf32>
    %136 = tpu.matmul %134, %135, %cst_57 {dimension_numbers = #tpu.dot_dimension_numbers<[1], [0], [0], [1], [0, 0, 1, 1], [], []>} : vector<16x64xf32>, vector<64x32xf32>, vector<16x32xf32> -> vector<16x32xf32>
    %c9 = arith.constant 9 : index
    %c0_58 = arith.constant 0 : index
    %137 = vector.load %arg8[%c9, %c0_58] : memref<26x128xf32, #tpu.memory_space<vmem>>, vector<1x32xf32>
    %138 = vector.broadcast %137 : vector<1x32xf32> to vector<16x32xf32>
    %139 = arith.addf %136, %138 : vector<16x32xf32>
    %140 = arith.addf %116, %139 : vector<16x32xf32>
    %cst_59 = arith.constant dense<0.000000e+00> : vector<16xf32>
    %141 = vector.multi_reduction <add>, %140, %cst_59 [1] : vector<16x32xf32> to vector<16xf32>
    %142 = vector.shape_cast %141 : vector<16xf32> to vector<16x1xf32>
    %cst_60 = arith.constant 3.125000e-02 : f32
    %143 = vector.broadcast %cst_60 : f32 to vector<16x1xf32>
    %144 = arith.mulf %142, %143 : vector<16x1xf32>
    %145 = arith.mulf %140, %140 : vector<16x32xf32>
    %cst_61 = arith.constant dense<0.000000e+00> : vector<16xf32>
    %146 = vector.multi_reduction <add>, %145, %cst_61 [1] : vector<16x32xf32> to vector<16xf32>
    %147 = vector.shape_cast %146 : vector<16xf32> to vector<16x1xf32>
    %cst_62 = arith.constant 3.125000e-02 : f32
    %148 = vector.broadcast %cst_62 : f32 to vector<16x1xf32>
    %149 = arith.mulf %147, %148 : vector<16x1xf32>
    %150 = arith.mulf %144, %144 : vector<16x1xf32>
    %151 = arith.subf %149, %150 : vector<16x1xf32>
    %152 = vector.broadcast %144 : vector<16x1xf32> to vector<16x32xf32>
    %153 = arith.subf %140, %152 : vector<16x32xf32>
    %cst_63 = arith.constant 9.99999996E-13 : f32
    %154 = vector.broadcast %cst_63 : f32 to vector<16x1xf32>
    %155 = arith.addf %151, %154 : vector<16x1xf32>
    %156 = math.rsqrt %155 : vector<16x1xf32>
    %157 = vector.broadcast %156 : vector<16x1xf32> to vector<16x32xf32>
    %158 = arith.mulf %153, %157 : vector<16x32xf32>
    %c10 = arith.constant 10 : index
    %c0_64 = arith.constant 0 : index
    %159 = vector.load %arg8[%c10, %c0_64] : memref<26x128xf32, #tpu.memory_space<vmem>>, vector<1x32xf32>
    %160 = vector.broadcast %159 : vector<1x32xf32> to vector<16x32xf32>
    %161 = arith.mulf %158, %160 : vector<16x32xf32>
    %c11 = arith.constant 11 : index
    %c0_65 = arith.constant 0 : index
    %162 = vector.load %arg8[%c11, %c0_65] : memref<26x128xf32, #tpu.memory_space<vmem>>, vector<1x32xf32>
    %163 = vector.broadcast %162 : vector<1x32xf32> to vector<16x32xf32>
    %164 = arith.addf %161, %163 : vector<16x32xf32>
    %165 = vector.shape_cast %2 : vector<2x8x16xf32> to vector<16x16xf32>
    %c16 = arith.constant 16 : index
    %c0_66 = arith.constant 0 : index
    %166 = vector.load %arg7[%c16, %c0_66] : memref<480x128xf32, #tpu.memory_space<vmem>>, vector<16x32xf32>
    %cst_67 = arith.constant dense<0.000000e+00> : vector<16x32xf32>
    %167 = tpu.matmul %165, %166, %cst_67 {dimension_numbers = #tpu.dot_dimension_numbers<[1], [0], [0], [1], [0, 0, 1, 1], [], []>} : vector<16x16xf32>, vector<16x32xf32>, vector<16x32xf32> -> vector<16x32xf32>
    %c3 = arith.constant 3 : index
    %c0_68 = arith.constant 0 : index
    %168 = vector.load %arg8[%c3, %c0_68] : memref<26x128xf32, #tpu.memory_space<vmem>>, vector<1x32xf32>
    %169 = vector.broadcast %168 : vector<1x32xf32> to vector<16x32xf32>
    %170 = arith.addf %167, %169 : vector<16x32xf32>
    %171 = vector.shape_cast %170 : vector<16x32xf32> to vector<2x8x32xf32>
    %172 = vector.shape_cast %3 : vector<8x32xf32> to vector<1x8x32xf32>
    %173 = vector.broadcast %172 : vector<1x8x32xf32> to vector<2x8x32xf32>
    %174 = arith.addf %171, %173 : vector<2x8x32xf32>
    %175 = vector.shape_cast %174 : vector<2x8x32xf32> to vector<16x32xf32>
    %176 = tpu.iota {dimensions = array<i32: 0>} : vector<8x8xi32>
    %177 = tpu.iota {dimensions = array<i32: 1>} : vector<8x8xi32>
    %178 = arith.cmpi sle, %177, %176 : vector<8x8xi32>
    %cst_69 = arith.constant 0.000000e+00 : f32
    %cst_70 = arith.constant -1.000000e+09 : f32
    %179 = vector.broadcast %cst_69 : f32 to vector<8x8xf32>
    %180 = vector.broadcast %cst_70 : f32 to vector<8x8xf32>
    %181 = arith.select %178, %179, %180 : vector<8x8xi1>, vector<8x8xf32>
    %182 = vector.shape_cast %181 : vector<8x8xf32> to vector<1x8x8xf32>
    %183 = vector.broadcast %182 : vector<1x8x8xf32> to vector<2x8x8xf32>
    %184 = vector.broadcast %5 : vector<2x1x8xf32> to vector<2x8x8xf32>
    %185 = arith.addf %183, %184 : vector<2x8x8xf32>
    %c192 = arith.constant 192 : index
    %c0_71 = arith.constant 0 : index
    %186 = vector.load %arg7[%c192, %c0_71] : memref<480x128xf32, #tpu.memory_space<vmem>>, vector<32x96xf32>
    %cst_72 = arith.constant dense<0.000000e+00> : vector<16x96xf32>
    %187 = tpu.matmul %175, %186, %cst_72 {dimension_numbers = #tpu.dot_dimension_numbers<[1], [0], [0], [1], [0, 0, 1, 1], [], []>} : vector<16x32xf32>, vector<32x96xf32>, vector<16x96xf32> -> vector<16x96xf32>
    %c12 = arith.constant 12 : index
    %c0_73 = arith.constant 0 : index
    %188 = vector.load %arg8[%c12, %c0_73] : memref<26x128xf32, #tpu.memory_space<vmem>>, vector<1x96xf32>
    %189 = vector.broadcast %188 : vector<1x96xf32> to vector<16x96xf32>
    %190 = arith.addf %187, %189 : vector<16x96xf32>
    %191 = vector.extract_strided_slice %190 {offsets = [0, 0], sizes = [16, 32], strides = [1, 1]} : vector<16x96xf32> to vector<16x32xf32>
    %192 = vector.extract_strided_slice %190 {offsets = [0, 32], sizes = [16, 32], strides = [1, 1]} : vector<16x96xf32> to vector<16x32xf32>
    %193 = vector.extract_strided_slice %190 {offsets = [0, 64], sizes = [16, 32], strides = [1, 1]} : vector<16x96xf32> to vector<16x32xf32>
    %194 = vector.shape_cast %191 : vector<16x32xf32> to vector<2x8x32xf32>
    %195 = vector.shape_cast %192 : vector<16x32xf32> to vector<2x8x32xf32>
    %196 = vector.shape_cast %193 : vector<16x32xf32> to vector<2x8x32xf32>
    %197 = vector.extract_strided_slice %194 {offsets = [0, 0, 0], sizes = [2, 8, 16], strides = [1, 1, 1]} : vector<2x8x32xf32> to vector<2x8x16xf32>
    %198 = vector.extract_strided_slice %195 {offsets = [0, 0, 0], sizes = [2, 8, 16], strides = [1, 1, 1]} : vector<2x8x32xf32> to vector<2x8x16xf32>
    "tpu.trace_start"() <{level = 10 : i32, message = "bqd,bkd->bqk"}> : () -> ()
    %cst_74 = arith.constant dense<0.000000e+00> : vector<2x8x8xf32>
    %199 = tpu.matmul %197, %198, %cst_74 {dimension_numbers = #tpu.dot_dimension_numbers<[2], [2], [1], [1], [0, 0, 0, 1, 1, 1], [0], [0]>} : vector<2x8x16xf32>, vector<2x8x16xf32>, vector<2x8x8xf32> -> vector<2x8x8xf32>
    "tpu.trace_stop"() : () -> ()
    %cst_75 = arith.constant 2.500000e-01 : f32
    %200 = vector.broadcast %cst_75 : f32 to vector<2x8x8xf32>
    %201 = arith.mulf %199, %200 : vector<2x8x8xf32>
    %202 = arith.addf %201, %185 : vector<2x8x8xf32>
    %cst_76 = arith.constant dense<0xFF800000> : vector<2x8xf32>
    %203 = vector.multi_reduction <maximumf>, %202, %cst_76 [2] : vector<2x8x8xf32> to vector<2x8xf32>
    %204 = vector.shape_cast %203 : vector<2x8xf32> to vector<2x8x1xf32>
    %205 = vector.broadcast %204 : vector<2x8x1xf32> to vector<2x8x8xf32>
    %206 = arith.subf %202, %205 : vector<2x8x8xf32>
    %207 = math.exp %206 : vector<2x8x8xf32>
    %cst_77 = arith.constant dense<0.000000e+00> : vector<2x8xf32>
    %208 = vector.multi_reduction <add>, %207, %cst_77 [2] : vector<2x8x8xf32> to vector<2x8xf32>
    %209 = vector.shape_cast %208 : vector<2x8xf32> to vector<2x8x1xf32>
    %210 = tpu.reciprocal %209 {approx = true} : vector<2x8x1xf32> -> vector<2x8x1xf32>
    %211 = vector.extract_strided_slice %196 {offsets = [0, 0, 0], sizes = [2, 8, 16], strides = [1, 1, 1]} : vector<2x8x32xf32> to vector<2x8x16xf32>
    "tpu.trace_start"() <{level = 10 : i32, message = "bqk,bkd->bqd"}> : () -> ()
    %cst_78 = arith.constant dense<0.000000e+00> : vector<2x8x16xf32>
    %212 = tpu.matmul %207, %211, %cst_78 {dimension_numbers = #tpu.dot_dimension_numbers<[2], [1], [1], [2], [0, 0, 0, 1, 1, 2], [0], [0]>} : vector<2x8x8xf32>, vector<2x8x16xf32>, vector<2x8x16xf32> -> vector<2x8x16xf32>
    "tpu.trace_stop"() : () -> ()
    %213 = vector.broadcast %210 : vector<2x8x1xf32> to vector<2x8x16xf32>
    %214 = arith.mulf %212, %213 : vector<2x8x16xf32>
    %215 = vector.shape_cast %214 : vector<2x8x16xf32> to vector<16x16xf32>
    %216 = vector.extract_strided_slice %194 {offsets = [0, 0, 16], sizes = [2, 8, 16], strides = [1, 1, 1]} : vector<2x8x32xf32> to vector<2x8x16xf32>
    %217 = vector.extract_strided_slice %195 {offsets = [0, 0, 16], sizes = [2, 8, 16], strides = [1, 1, 1]} : vector<2x8x32xf32> to vector<2x8x16xf32>
    "tpu.trace_start"() <{level = 10 : i32, message = "bqd,bkd->bqk"}> : () -> ()
    %cst_79 = arith.constant dense<0.000000e+00> : vector<2x8x8xf32>
    %218 = tpu.matmul %216, %217, %cst_79 {dimension_numbers = #tpu.dot_dimension_numbers<[2], [2], [1], [1], [0, 0, 0, 1, 1, 1], [0], [0]>} : vector<2x8x16xf32>, vector<2x8x16xf32>, vector<2x8x8xf32> -> vector<2x8x8xf32>
    "tpu.trace_stop"() : () -> ()
    %cst_80 = arith.constant 2.500000e-01 : f32
    %219 = vector.broadcast %cst_80 : f32 to vector<2x8x8xf32>
    %220 = arith.mulf %218, %219 : vector<2x8x8xf32>
    %221 = arith.addf %220, %185 : vector<2x8x8xf32>
    %cst_81 = arith.constant dense<0xFF800000> : vector<2x8xf32>
    %222 = vector.multi_reduction <maximumf>, %221, %cst_81 [2] : vector<2x8x8xf32> to vector<2x8xf32>
    %223 = vector.shape_cast %222 : vector<2x8xf32> to vector<2x8x1xf32>
    %224 = vector.broadcast %223 : vector<2x8x1xf32> to vector<2x8x8xf32>
    %225 = arith.subf %221, %224 : vector<2x8x8xf32>
    %226 = math.exp %225 : vector<2x8x8xf32>
    %cst_82 = arith.constant dense<0.000000e+00> : vector<2x8xf32>
    %227 = vector.multi_reduction <add>, %226, %cst_82 [2] : vector<2x8x8xf32> to vector<2x8xf32>
    %228 = vector.shape_cast %227 : vector<2x8xf32> to vector<2x8x1xf32>
    %229 = tpu.reciprocal %228 {approx = true} : vector<2x8x1xf32> -> vector<2x8x1xf32>
    %230 = vector.extract_strided_slice %196 {offsets = [0, 0, 16], sizes = [2, 8, 16], strides = [1, 1, 1]} : vector<2x8x32xf32> to vector<2x8x16xf32>
    "tpu.trace_start"() <{level = 10 : i32, message = "bqk,bkd->bqd"}> : () -> ()
    %cst_83 = arith.constant dense<0.000000e+00> : vector<2x8x16xf32>
    %231 = tpu.matmul %226, %230, %cst_83 {dimension_numbers = #tpu.dot_dimension_numbers<[2], [1], [1], [2], [0, 0, 0, 1, 1, 2], [0], [0]>} : vector<2x8x8xf32>, vector<2x8x16xf32>, vector<2x8x16xf32> -> vector<2x8x16xf32>
    "tpu.trace_stop"() : () -> ()
    %232 = vector.broadcast %229 : vector<2x8x1xf32> to vector<2x8x16xf32>
    %233 = arith.mulf %231, %232 : vector<2x8x16xf32>
    %234 = vector.shape_cast %233 : vector<2x8x16xf32> to vector<16x16xf32>
    %235 = tpu.concatenate %215, %234 in 1 : vector<16x16xf32>, vector<16x16xf32> -> vector<16x32xf32>
    %c224 = arith.constant 224 : index
    %c0_84 = arith.constant 0 : index
    %236 = vector.load %arg7[%c224, %c0_84] : memref<480x128xf32, #tpu.memory_space<vmem>>, vector<32x32xf32>
    %cst_85 = arith.constant dense<0.000000e+00> : vector<16x32xf32>
    %237 = tpu.matmul %235, %236, %cst_85 {dimension_numbers = #tpu.dot_dimension_numbers<[1], [0], [0], [1], [0, 0, 1, 1], [], []>} : vector<16x32xf32>, vector<32x32xf32>, vector<16x32xf32> -> vector<16x32xf32>
    %c13 = arith.constant 13 : index
    %c0_86 = arith.constant 0 : index
    %238 = vector.load %arg8[%c13, %c0_86] : memref<26x128xf32, #tpu.memory_space<vmem>>, vector<1x32xf32>
    %239 = vector.broadcast %238 : vector<1x32xf32> to vector<16x32xf32>
    %240 = arith.addf %237, %239 : vector<16x32xf32>
    %241 = arith.addf %175, %240 : vector<16x32xf32>
    %cst_87 = arith.constant dense<0.000000e+00> : vector<16xf32>
    %242 = vector.multi_reduction <add>, %241, %cst_87 [1] : vector<16x32xf32> to vector<16xf32>
    %243 = vector.shape_cast %242 : vector<16xf32> to vector<16x1xf32>
    %cst_88 = arith.constant 3.125000e-02 : f32
    %244 = vector.broadcast %cst_88 : f32 to vector<16x1xf32>
    %245 = arith.mulf %243, %244 : vector<16x1xf32>
    %246 = arith.mulf %241, %241 : vector<16x32xf32>
    %cst_89 = arith.constant dense<0.000000e+00> : vector<16xf32>
    %247 = vector.multi_reduction <add>, %246, %cst_89 [1] : vector<16x32xf32> to vector<16xf32>
    %248 = vector.shape_cast %247 : vector<16xf32> to vector<16x1xf32>
    %cst_90 = arith.constant 3.125000e-02 : f32
    %249 = vector.broadcast %cst_90 : f32 to vector<16x1xf32>
    %250 = arith.mulf %248, %249 : vector<16x1xf32>
    %251 = arith.mulf %245, %245 : vector<16x1xf32>
    %252 = arith.subf %250, %251 : vector<16x1xf32>
    %253 = vector.broadcast %245 : vector<16x1xf32> to vector<16x32xf32>
    %254 = arith.subf %241, %253 : vector<16x32xf32>
    %cst_91 = arith.constant 9.99999996E-13 : f32
    %255 = vector.broadcast %cst_91 : f32 to vector<16x1xf32>
    %256 = arith.addf %252, %255 : vector<16x1xf32>
    %257 = math.rsqrt %256 : vector<16x1xf32>
    %258 = vector.broadcast %257 : vector<16x1xf32> to vector<16x32xf32>
    %259 = arith.mulf %254, %258 : vector<16x32xf32>
    %c14 = arith.constant 14 : index
    %c0_92 = arith.constant 0 : index
    %260 = vector.load %arg8[%c14, %c0_92] : memref<26x128xf32, #tpu.memory_space<vmem>>, vector<1x32xf32>
    %261 = vector.broadcast %260 : vector<1x32xf32> to vector<16x32xf32>
    %262 = arith.mulf %259, %261 : vector<16x32xf32>
    %c15 = arith.constant 15 : index
    %c0_93 = arith.constant 0 : index
    %263 = vector.load %arg8[%c15, %c0_93] : memref<26x128xf32, #tpu.memory_space<vmem>>, vector<1x32xf32>
    %264 = vector.broadcast %263 : vector<1x32xf32> to vector<16x32xf32>
    %265 = arith.addf %262, %264 : vector<16x32xf32>
    %c256 = arith.constant 256 : index
    %c0_94 = arith.constant 0 : index
    %266 = vector.load %arg7[%c256, %c0_94] : memref<480x128xf32, #tpu.memory_space<vmem>>, vector<32x32xf32>
    %cst_95 = arith.constant dense<0.000000e+00> : vector<16x32xf32>
    %267 = tpu.matmul %265, %266, %cst_95 {dimension_numbers = #tpu.dot_dimension_numbers<[1], [0], [0], [1], [0, 0, 1, 1], [], []>} : vector<16x32xf32>, vector<32x32xf32>, vector<16x32xf32> -> vector<16x32xf32>
    %c16_96 = arith.constant 16 : index
    %c0_97 = arith.constant 0 : index
    %268 = vector.load %arg8[%c16_96, %c0_97] : memref<26x128xf32, #tpu.memory_space<vmem>>, vector<1x32xf32>
    %269 = vector.broadcast %268 : vector<1x32xf32> to vector<16x32xf32>
    %270 = arith.addf %267, %269 : vector<16x32xf32>
    %c288 = arith.constant 288 : index
    %c0_98 = arith.constant 0 : index
    %271 = vector.load %arg7[%c288, %c0_98] : memref<480x128xf32, #tpu.memory_space<vmem>>, vector<32x64xf32>
    %cst_99 = arith.constant dense<0.000000e+00> : vector<16x64xf32>
    %272 = tpu.matmul %164, %271, %cst_99 {dimension_numbers = #tpu.dot_dimension_numbers<[1], [0], [0], [1], [0, 0, 1, 1], [], []>} : vector<16x32xf32>, vector<32x64xf32>, vector<16x64xf32> -> vector<16x64xf32>
    %c17 = arith.constant 17 : index
    %c0_100 = arith.constant 0 : index
    %273 = vector.load %arg8[%c17, %c0_100] : memref<26x128xf32, #tpu.memory_space<vmem>>, vector<1x64xf32>
    %274 = vector.broadcast %273 : vector<1x64xf32> to vector<16x64xf32>
    %275 = arith.addf %272, %274 : vector<16x64xf32>
    %276 = vector.extract_strided_slice %275 {offsets = [0, 0], sizes = [16, 32], strides = [1, 1]} : vector<16x64xf32> to vector<16x32xf32>
    %277 = vector.extract_strided_slice %275 {offsets = [0, 32], sizes = [16, 32], strides = [1, 1]} : vector<16x64xf32> to vector<16x32xf32>
    %278 = vector.shape_cast %270 : vector<16x32xf32> to vector<2x8x32xf32>
    %279 = vector.shape_cast %276 : vector<16x32xf32> to vector<2x8x32xf32>
    %280 = vector.shape_cast %277 : vector<16x32xf32> to vector<2x8x32xf32>
    %281 = vector.extract_strided_slice %278 {offsets = [0, 0, 0], sizes = [2, 8, 16], strides = [1, 1, 1]} : vector<2x8x32xf32> to vector<2x8x16xf32>
    %282 = vector.extract_strided_slice %279 {offsets = [0, 0, 0], sizes = [2, 8, 16], strides = [1, 1, 1]} : vector<2x8x32xf32> to vector<2x8x16xf32>
    "tpu.trace_start"() <{level = 10 : i32, message = "bqd,bkd->bqk"}> : () -> ()
    %cst_101 = arith.constant dense<0.000000e+00> : vector<2x8x8xf32>
    %283 = tpu.matmul %281, %282, %cst_101 {dimension_numbers = #tpu.dot_dimension_numbers<[2], [2], [1], [1], [0, 0, 0, 1, 1, 1], [0], [0]>} : vector<2x8x16xf32>, vector<2x8x16xf32>, vector<2x8x8xf32> -> vector<2x8x8xf32>
    "tpu.trace_stop"() : () -> ()
    %cst_102 = arith.constant 2.500000e-01 : f32
    %284 = vector.broadcast %cst_102 : f32 to vector<2x8x8xf32>
    %285 = arith.mulf %283, %284 : vector<2x8x8xf32>
    %286 = vector.broadcast %4 : vector<2x1x8xf32> to vector<2x8x8xf32>
    %287 = arith.addf %285, %286 : vector<2x8x8xf32>
    %cst_103 = arith.constant dense<0xFF800000> : vector<2x8xf32>
    %288 = vector.multi_reduction <maximumf>, %287, %cst_103 [2] : vector<2x8x8xf32> to vector<2x8xf32>
    %289 = vector.shape_cast %288 : vector<2x8xf32> to vector<2x8x1xf32>
    %290 = vector.broadcast %289 : vector<2x8x1xf32> to vector<2x8x8xf32>
    %291 = arith.subf %287, %290 : vector<2x8x8xf32>
    %292 = math.exp %291 : vector<2x8x8xf32>
    %cst_104 = arith.constant dense<0.000000e+00> : vector<2x8xf32>
    %293 = vector.multi_reduction <add>, %292, %cst_104 [2] : vector<2x8x8xf32> to vector<2x8xf32>
    %294 = vector.shape_cast %293 : vector<2x8xf32> to vector<2x8x1xf32>
    %295 = tpu.reciprocal %294 {approx = true} : vector<2x8x1xf32> -> vector<2x8x1xf32>
    %296 = vector.extract_strided_slice %280 {offsets = [0, 0, 0], sizes = [2, 8, 16], strides = [1, 1, 1]} : vector<2x8x32xf32> to vector<2x8x16xf32>
    "tpu.trace_start"() <{level = 10 : i32, message = "bqk,bkd->bqd"}> : () -> ()
    %cst_105 = arith.constant dense<0.000000e+00> : vector<2x8x16xf32>
    %297 = tpu.matmul %292, %296, %cst_105 {dimension_numbers = #tpu.dot_dimension_numbers<[2], [1], [1], [2], [0, 0, 0, 1, 1, 2], [0], [0]>} : vector<2x8x8xf32>, vector<2x8x16xf32>, vector<2x8x16xf32> -> vector<2x8x16xf32>
    "tpu.trace_stop"() : () -> ()
    %298 = vector.broadcast %295 : vector<2x8x1xf32> to vector<2x8x16xf32>
    %299 = arith.mulf %297, %298 : vector<2x8x16xf32>
    %300 = vector.shape_cast %299 : vector<2x8x16xf32> to vector<16x16xf32>
    %301 = vector.extract_strided_slice %278 {offsets = [0, 0, 16], sizes = [2, 8, 16], strides = [1, 1, 1]} : vector<2x8x32xf32> to vector<2x8x16xf32>
    %302 = vector.extract_strided_slice %279 {offsets = [0, 0, 16], sizes = [2, 8, 16], strides = [1, 1, 1]} : vector<2x8x32xf32> to vector<2x8x16xf32>
    "tpu.trace_start"() <{level = 10 : i32, message = "bqd,bkd->bqk"}> : () -> ()
    %cst_106 = arith.constant dense<0.000000e+00> : vector<2x8x8xf32>
    %303 = tpu.matmul %301, %302, %cst_106 {dimension_numbers = #tpu.dot_dimension_numbers<[2], [2], [1], [1], [0, 0, 0, 1, 1, 1], [0], [0]>} : vector<2x8x16xf32>, vector<2x8x16xf32>, vector<2x8x8xf32> -> vector<2x8x8xf32>
    "tpu.trace_stop"() : () -> ()
    %cst_107 = arith.constant 2.500000e-01 : f32
    %304 = vector.broadcast %cst_107 : f32 to vector<2x8x8xf32>
    %305 = arith.mulf %303, %304 : vector<2x8x8xf32>
    %306 = vector.broadcast %4 : vector<2x1x8xf32> to vector<2x8x8xf32>
    %307 = arith.addf %305, %306 : vector<2x8x8xf32>
    %cst_108 = arith.constant dense<0xFF800000> : vector<2x8xf32>
    %308 = vector.multi_reduction <maximumf>, %307, %cst_108 [2] : vector<2x8x8xf32> to vector<2x8xf32>
    %309 = vector.shape_cast %308 : vector<2x8xf32> to vector<2x8x1xf32>
    %310 = vector.broadcast %309 : vector<2x8x1xf32> to vector<2x8x8xf32>
    %311 = arith.subf %307, %310 : vector<2x8x8xf32>
    %312 = math.exp %311 : vector<2x8x8xf32>
    %cst_109 = arith.constant dense<0.000000e+00> : vector<2x8xf32>
    %313 = vector.multi_reduction <add>, %312, %cst_109 [2] : vector<2x8x8xf32> to vector<2x8xf32>
    %314 = vector.shape_cast %313 : vector<2x8xf32> to vector<2x8x1xf32>
    %315 = tpu.reciprocal %314 {approx = true} : vector<2x8x1xf32> -> vector<2x8x1xf32>
    %316 = vector.extract_strided_slice %280 {offsets = [0, 0, 16], sizes = [2, 8, 16], strides = [1, 1, 1]} : vector<2x8x32xf32> to vector<2x8x16xf32>
    "tpu.trace_start"() <{level = 10 : i32, message = "bqk,bkd->bqd"}> : () -> ()
    %cst_110 = arith.constant dense<0.000000e+00> : vector<2x8x16xf32>
    %317 = tpu.matmul %312, %316, %cst_110 {dimension_numbers = #tpu.dot_dimension_numbers<[2], [1], [1], [2], [0, 0, 0, 1, 1, 2], [0], [0]>} : vector<2x8x8xf32>, vector<2x8x16xf32>, vector<2x8x16xf32> -> vector<2x8x16xf32>
    "tpu.trace_stop"() : () -> ()
    %318 = vector.broadcast %315 : vector<2x8x1xf32> to vector<2x8x16xf32>
    %319 = arith.mulf %317, %318 : vector<2x8x16xf32>
    %320 = vector.shape_cast %319 : vector<2x8x16xf32> to vector<16x16xf32>
    %321 = tpu.concatenate %300, %320 in 1 : vector<16x16xf32>, vector<16x16xf32> -> vector<16x32xf32>
    %c320 = arith.constant 320 : index
    %c0_111 = arith.constant 0 : index
    %322 = vector.load %arg7[%c320, %c0_111] : memref<480x128xf32, #tpu.memory_space<vmem>>, vector<32x32xf32>
    %cst_112 = arith.constant dense<0.000000e+00> : vector<16x32xf32>
    %323 = tpu.matmul %321, %322, %cst_112 {dimension_numbers = #tpu.dot_dimension_numbers<[1], [0], [0], [1], [0, 0, 1, 1], [], []>} : vector<16x32xf32>, vector<32x32xf32>, vector<16x32xf32> -> vector<16x32xf32>
    %c18 = arith.constant 18 : index
    %c0_113 = arith.constant 0 : index
    %324 = vector.load %arg8[%c18, %c0_113] : memref<26x128xf32, #tpu.memory_space<vmem>>, vector<1x32xf32>
    %325 = vector.broadcast %324 : vector<1x32xf32> to vector<16x32xf32>
    %326 = arith.addf %323, %325 : vector<16x32xf32>
    %327 = arith.addf %265, %326 : vector<16x32xf32>
    %cst_114 = arith.constant dense<0.000000e+00> : vector<16xf32>
    %328 = vector.multi_reduction <add>, %327, %cst_114 [1] : vector<16x32xf32> to vector<16xf32>
    %329 = vector.shape_cast %328 : vector<16xf32> to vector<16x1xf32>
    %cst_115 = arith.constant 3.125000e-02 : f32
    %330 = vector.broadcast %cst_115 : f32 to vector<16x1xf32>
    %331 = arith.mulf %329, %330 : vector<16x1xf32>
    %332 = arith.mulf %327, %327 : vector<16x32xf32>
    %cst_116 = arith.constant dense<0.000000e+00> : vector<16xf32>
    %333 = vector.multi_reduction <add>, %332, %cst_116 [1] : vector<16x32xf32> to vector<16xf32>
    %334 = vector.shape_cast %333 : vector<16xf32> to vector<16x1xf32>
    %cst_117 = arith.constant 3.125000e-02 : f32
    %335 = vector.broadcast %cst_117 : f32 to vector<16x1xf32>
    %336 = arith.mulf %334, %335 : vector<16x1xf32>
    %337 = arith.mulf %331, %331 : vector<16x1xf32>
    %338 = arith.subf %336, %337 : vector<16x1xf32>
    %339 = vector.broadcast %331 : vector<16x1xf32> to vector<16x32xf32>
    %340 = arith.subf %327, %339 : vector<16x32xf32>
    %cst_118 = arith.constant 9.99999996E-13 : f32
    %341 = vector.broadcast %cst_118 : f32 to vector<16x1xf32>
    %342 = arith.addf %338, %341 : vector<16x1xf32>
    %343 = math.rsqrt %342 : vector<16x1xf32>
    %344 = vector.broadcast %343 : vector<16x1xf32> to vector<16x32xf32>
    %345 = arith.mulf %340, %344 : vector<16x32xf32>
    %c19 = arith.constant 19 : index
    %c0_119 = arith.constant 0 : index
    %346 = vector.load %arg8[%c19, %c0_119] : memref<26x128xf32, #tpu.memory_space<vmem>>, vector<1x32xf32>
    %347 = vector.broadcast %346 : vector<1x32xf32> to vector<16x32xf32>
    %348 = arith.mulf %345, %347 : vector<16x32xf32>
    %c20 = arith.constant 20 : index
    %c0_120 = arith.constant 0 : index
    %349 = vector.load %arg8[%c20, %c0_120] : memref<26x128xf32, #tpu.memory_space<vmem>>, vector<1x32xf32>
    %350 = vector.broadcast %349 : vector<1x32xf32> to vector<16x32xf32>
    %351 = arith.addf %348, %350 : vector<16x32xf32>
    %c352 = arith.constant 352 : index
    %c0_121 = arith.constant 0 : index
    %352 = vector.load %arg7[%c352, %c0_121] : memref<480x128xf32, #tpu.memory_space<vmem>>, vector<32x64xf32>
    %cst_122 = arith.constant dense<0.000000e+00> : vector<16x64xf32>
    %353 = tpu.matmul %351, %352, %cst_122 {dimension_numbers = #tpu.dot_dimension_numbers<[1], [0], [0], [1], [0, 0, 1, 1], [], []>} : vector<16x32xf32>, vector<32x64xf32>, vector<16x64xf32> -> vector<16x64xf32>
    %c21 = arith.constant 21 : index
    %c0_123 = arith.constant 0 : index
    %354 = vector.load %arg8[%c21, %c0_123] : memref<26x128xf32, #tpu.memory_space<vmem>>, vector<1x64xf32>
    %355 = vector.broadcast %354 : vector<1x64xf32> to vector<16x64xf32>
    %356 = arith.addf %353, %355 : vector<16x64xf32>
    %357 = arith.mulf %356, %356 : vector<16x64xf32>
    %358 = arith.mulf %356, %357 : vector<16x64xf32>
    %cst_124 = arith.constant 4.471500e-02 : f32
    %359 = vector.broadcast %cst_124 : f32 to vector<16x64xf32>
    %360 = arith.mulf %359, %358 : vector<16x64xf32>
    %361 = arith.addf %356, %360 : vector<16x64xf32>
    %cst_125 = arith.constant 0.797884583 : f32
    %362 = vector.broadcast %cst_125 : f32 to vector<16x64xf32>
    %363 = arith.mulf %362, %361 : vector<16x64xf32>
    %364 = math.tanh %363 : vector<16x64xf32>
    %cst_126 = arith.constant 1.000000e+00 : f32
    %365 = vector.broadcast %cst_126 : f32 to vector<16x64xf32>
    %366 = arith.addf %365, %364 : vector<16x64xf32>
    %cst_127 = arith.constant 5.000000e-01 : f32
    %367 = vector.broadcast %cst_127 : f32 to vector<16x64xf32>
    %368 = arith.mulf %367, %366 : vector<16x64xf32>
    %369 = arith.mulf %356, %368 : vector<16x64xf32>
    %c384 = arith.constant 384 : index
    %c0_128 = arith.constant 0 : index
    %370 = vector.load %arg7[%c384, %c0_128] : memref<480x128xf32, #tpu.memory_space<vmem>>, vector<64x32xf32>
    %cst_129 = arith.constant dense<0.000000e+00> : vector<16x32xf32>
    %371 = tpu.matmul %369, %370, %cst_129 {dimension_numbers = #tpu.dot_dimension_numbers<[1], [0], [0], [1], [0, 0, 1, 1], [], []>} : vector<16x64xf32>, vector<64x32xf32>, vector<16x32xf32> -> vector<16x32xf32>
    %c22 = arith.constant 22 : index
    %c0_130 = arith.constant 0 : index
    %372 = vector.load %arg8[%c22, %c0_130] : memref<26x128xf32, #tpu.memory_space<vmem>>, vector<1x32xf32>
    %373 = vector.broadcast %372 : vector<1x32xf32> to vector<16x32xf32>
    %374 = arith.addf %371, %373 : vector<16x32xf32>
    %375 = arith.addf %351, %374 : vector<16x32xf32>
    %cst_131 = arith.constant dense<0.000000e+00> : vector<16xf32>
    %376 = vector.multi_reduction <add>, %375, %cst_131 [1] : vector<16x32xf32> to vector<16xf32>
    %377 = vector.shape_cast %376 : vector<16xf32> to vector<16x1xf32>
    %cst_132 = arith.constant 3.125000e-02 : f32
    %378 = vector.broadcast %cst_132 : f32 to vector<16x1xf32>
    %379 = arith.mulf %377, %378 : vector<16x1xf32>
    %380 = arith.mulf %375, %375 : vector<16x32xf32>
    %cst_133 = arith.constant dense<0.000000e+00> : vector<16xf32>
    %381 = vector.multi_reduction <add>, %380, %cst_133 [1] : vector<16x32xf32> to vector<16xf32>
    %382 = vector.shape_cast %381 : vector<16xf32> to vector<16x1xf32>
    %cst_134 = arith.constant 3.125000e-02 : f32
    %383 = vector.broadcast %cst_134 : f32 to vector<16x1xf32>
    %384 = arith.mulf %382, %383 : vector<16x1xf32>
    %385 = arith.mulf %379, %379 : vector<16x1xf32>
    %386 = arith.subf %384, %385 : vector<16x1xf32>
    %387 = vector.broadcast %379 : vector<16x1xf32> to vector<16x32xf32>
    %388 = arith.subf %375, %387 : vector<16x32xf32>
    %cst_135 = arith.constant 9.99999996E-13 : f32
    %389 = vector.broadcast %cst_135 : f32 to vector<16x1xf32>
    %390 = arith.addf %386, %389 : vector<16x1xf32>
    %391 = math.rsqrt %390 : vector<16x1xf32>
    %392 = vector.broadcast %391 : vector<16x1xf32> to vector<16x32xf32>
    %393 = arith.mulf %388, %392 : vector<16x32xf32>
    %c23 = arith.constant 23 : index
    %c0_136 = arith.constant 0 : index
    %394 = vector.load %arg8[%c23, %c0_136] : memref<26x128xf32, #tpu.memory_space<vmem>>, vector<1x32xf32>
    %395 = vector.broadcast %394 : vector<1x32xf32> to vector<16x32xf32>
    %396 = arith.mulf %393, %395 : vector<16x32xf32>
    %c24 = arith.constant 24 : index
    %c0_137 = arith.constant 0 : index
    %397 = vector.load %arg8[%c24, %c0_137] : memref<26x128xf32, #tpu.memory_space<vmem>>, vector<1x32xf32>
    %398 = vector.broadcast %397 : vector<1x32xf32> to vector<16x32xf32>
    %399 = arith.addf %396, %398 : vector<16x32xf32>
    %c448 = arith.constant 448 : index
    %c0_138 = arith.constant 0 : index
    %400 = vector.load %arg7[%c448, %c0_138] : memref<480x128xf32, #tpu.memory_space<vmem>>, vector<32x128xf32>
    %cst_139 = arith.constant dense<0.000000e+00> : vector<16x128xf32>
    %401 = tpu.matmul %399, %400, %cst_139 {dimension_numbers = #tpu.dot_dimension_numbers<[1], [0], [0], [1], [0, 0, 1, 1], [], []>} : vector<16x32xf32>, vector<32x128xf32>, vector<16x128xf32> -> vector<16x128xf32>
    %c25 = arith.constant 25 : index
    %c0_140 = arith.constant 0 : index
    %402 = vector.load %arg8[%c25, %c0_140] : memref<26x128xf32, #tpu.memory_space<vmem>>, vector<1x128xf32>
    %403 = vector.broadcast %402 : vector<1x128xf32> to vector<16x128xf32>
    %404 = arith.addf %401, %403 : vector<16x128xf32>
    %405 = vector.shape_cast %404 : vector<16x128xf32> to vector<2x8x128xf32>
    %c0_141 = arith.constant 0 : index
    %c0_142 = arith.constant 0 : index
    %c0_143 = arith.constant 0 : index
    %406 = vector.load %arg9[%c0_141, %c0_142, %c0_143] : memref<2x8x128xf32, #tpu.memory_space<vmem>>, vector<2x8x128xf32>
    tpu.vector_store %arg9[%c0_141, %c0_142, %c0_143], %405 {strides = array<i32>} : memref<2x8x128xf32, #tpu.memory_space<vmem>>, vector<2x8x128xf32>,
    return
  }
  func.func @transform_0(%arg0: i32) -> (i32, i32, i32) {
    %c0_i32 = arith.constant 0 : i32
    %c0_i32_0 = arith.constant 0 : i32
    %c0_i32_1 = arith.constant 0 : i32
    %c0_i32_2 = arith.constant 0 : i32
    return %c0_i32, %c0_i32_0, %c0_i32_1 : i32, i32, i32
  }
  func.func @transform_1(%arg0: i32) -> (i32, i32) {
    %c0_i32 = arith.constant 0 : i32
    %c0_i32_0 = arith.constant 0 : i32
    %c0_i32_1 = arith.constant 0 : i32
    return %c0_i32, %c0_i32_0 : i32, i32
  }
  func.func @transform_2(%arg0: i32) -> (i32, i32, i32) {
    %c0_i32 = arith.constant 0 : i32
    %c0_i32_0 = arith.constant 0 : i32
    %c0_i32_1 = arith.constant 0 : i32
    %c0_i32_2 = arith.constant 0 : i32
    return %c0_i32, %c0_i32_0, %c0_i32_1 : i32, i32, i32
  }
  func.func @transform_3(%arg0: i32) -> (i32, i32) {
    %c0_i32 = arith.constant 0 : i32
    %c0_i32_0 = arith.constant 0 : i32
    %c0_i32_1 = arith.constant 0 : i32
    return %c0_i32, %c0_i32_0 : i32, i32
  }
  func.func @transform_4(%arg0: i32) -> (i32, i32, i32) {
    %c0_i32 = arith.constant 0 : i32
    %c0_i32_0 = arith.constant 0 : i32
    %c0_i32_1 = arith.constant 0 : i32
    %c0_i32_2 = arith.constant 0 : i32
    return %c0_i32, %c0_i32_0, %c0_i32_1 : i32, i32, i32
  }
  func.func @transform_5(%arg0: i32) -> (i32, i32, i32) {
    %c0_i32 = arith.constant 0 : i32
    %c0_i32_0 = arith.constant 0 : i32
    %c0_i32_1 = arith.constant 0 : i32
    %c0_i32_2 = arith.constant 0 : i32
    return %c0_i32, %c0_i32_0, %c0_i32_1 : i32, i32, i32
  }
  func.func @transform_6(%arg0: i32) -> (i32, i32) {
    %c0_i32 = arith.constant 0 : i32
    %c0_i32_0 = arith.constant 0 : i32
    %c0_i32_1 = arith.constant 0 : i32
    return %c0_i32, %c0_i32_0 : i32, i32
  }
  func.func @transform_7(%arg0: i32) -> (i32, i32) {
    %c0_i32 = arith.constant 0 : i32
    %c0_i32_0 = arith.constant 0 : i32
    %c0_i32_1 = arith.constant 0 : i32
    return %c0_i32, %c0_i32_0 : i32, i32
  }
  func.func @transform_8(%arg0: i32) -> (i32, i32, i32) {
    %c0_i32 = arith.constant 0 : i32
    %c0_i32_0 = arith.constant 0 : i32
    %c0_i32_1 = arith.constant 0 : i32
    %c0_i32_2 = arith.constant 0 : i32
    return %c0_i32, %c0_i32_0, %c0_i32_1 : i32, i32, i32
  }
}

</mosaic_0001>

<bundles_post_ra>
// kernel: pronunciation2spelling_forward.1
= control target key start
LH: loop header
LB: loop body
LE: loop exit
PB: predicated region body
PF: predicated region fallthrough
CT: control target
= control target key end

     0   :  { %13 = vsyncpa [#allocation3], 0  ;;  %s4866_s0 = inlined_call_operand.vmem [shape: f32[2,8,16], index: 0, kind: input, shape index: {}]   ;;  %s4867_s1 = inlined_call_operand.vmem [shape: f32[8,16], index: 1, kind: input, shape index: {}]   ;;  %s4868_s2 = inlined_call_operand.vmem [shape: f32[2,8,16], index: 2, kind: input, shape index: {}]   ;;  %s4869_s3 = inlined_call_operand.vmem [shape: f32[8,32], index: 3, kind: input, shape index: {}]   ;;  %s4870_s4 = inlined_call_operand.vmem [shape: f32[2,1,8], index: 4, kind: input, shape index: {}]   ;;  %s4871_s5 = inlined_call_operand.vmem [shape: f32[2,1,8], index: 5, kind: input, shape index: {}]   ;;  %s4872_s6 = inlined_call_operand.hbm [shape: f32[480,128], index: 6, kind: input, shape index: {}]   ;;  %s4873_s7 = inlined_call_operand.vmem [shape: f32[26,128], index: 7, kind: input, shape index: {}]   ;;  %s4874_s8 = inlined_call_operand.hbm [shape: f32[2,8,128], index: 8, kind: output, shape index: {}]  }
   0x1   :  { %14 = vsyncpa [#allocation4], 0  ;;  %s4358_s27 = smov [#allocation2]  }
   0x2   :  { %s32_s28 = sshll.u32 %s4358_s27, 4  ;;  %s33_s28 = int_to_ptr.vmem [resolvable:$true] %s32_s28 }
   0x3   :  { %s4322_s29 = scalar_lea.vmem %s33_s28, 7680  ;;  %p4327_p1 = scmp.lt.s32.totalorder %s33_s28, %s33_s28 }
   0x4   :  { %p4323_p0 = scmp.ne.s32.totalorder %s33_s28, %s4322_s29  ;;  %p4328_p2 = scmp.lt.s32.totalorder %s4322_s29, %s4322_s29 }
   0x6   :  { %p4329_p3 = por %p4328_p2, %p4327_p1 }
   0x8   :  { %p4330_p4 = pnand %p4329_p3, %p4323_p0 }
   0xa   :  { %4333 = shalt.err (!%p4330_p4)
}
   0xb   :  { %s4359_s30 = smov 128   ;;  %s4360_s9 = smov 8  }
   0xc   :  { %38 = dma.hbm_to_vmem [thread:$0]  %s4872_s6, 7680, %s33_s28, [#allocation3], %s4359_s30, %s4359_s30, %s4360_s9  }
   0xd   :  { %4354 = dma.done.wait [#allocation3], 7680  }
   0xe   :  { %4355 = vsyncadd [#allocation3], 4294959616  ;;  %v44_v0 = vld [vmem:[%s4866_s0] sm:$0xff]  ;;  %vm56_vm0 = vcmask 130048   ;;  %v45_v2 = vld [vmem:[%s4866_s0 + $0x8] sm:$0xff]  ;;  %vm198_vm1 = vcmask 261120  }
   0xf   :  { %v46_v1 = vld [vmem:[%s4867_s1] sm:$0xff]  ;;  %v102_v11 = vld [vmem:[#allocation2 + $0x8] sm:$0xff]  ;;  %v192_v13 = vld [vmem:[#allocation2 + $0x38] sm:$0xff]  ;;  %v4361_v48 = vmov 0.0   ;;  %vm4362_vm2 = vmmov 0   ;;  %s4363_s23 = smov 96  }
  0x10   :  { %v54_v3 = vadd.f32 %v46_v1, %v44_v0  ;;  %v55_v4 = vadd.f32 %v46_v1, %v45_v2  ;;  %3939 = vmatprep.subr.mxu1 %v102_v11  ;;  %v101_v12 = vld [vmem:[#allocation2] sm:$0xff]  ;;  %v191_v40 = vld [vmem:[#allocation2 + $0x30] sm:$0xff]  ;;  %v190_v41 = vld [vmem:[#allocation2 + $0x28] sm:$0xff]  ;;  %3957 = vmatprep.subr.mxu0 %v4361_v48  ;;  %vm436_vm3 = vcmask 64512   ;;  %s4364_s24 = smov 64   ;;  %s4365_s25 = smov 80  }
  0x11   :  { %3940 = vmatpush3.msra.mxu1 %v102_v11  ;;  %v3709_v30 = vld [vmem:[%s4873_s7] ss:$0 sm:$0xff]  ;;  %v3710_v32 = vld [vmem:[%s4873_s7 + $0x1] ss:$0 sm:$0xff]  ;;  %v3711_v44 = vld [vmem:[%s4873_s7 + $0x2] ss:$0 sm:$0xff]  ;;  %3959 = vmatprep.mubr.msk.f32.mxu0 %vm4362_vm2, %v4361_v48 }
  0x12   :  { %v57_v5 = vsel %vm56_vm0, %v54_v3, 0.0  ;;  %v65_v6 = vmul.f32 %v54_v3, %v54_v3  ;;  %v66_v7 = vmul.f32 %v55_v4, %v55_v4  ;;  %v60_v9 = vsel %vm56_vm0, %v55_v4, 0.0  ;;  %3941 = vmatprep.subr.mxu1 %v101_v12  ;;  %v189_v42 = vld [vmem:[#allocation2 + $0x20] sm:$0xff]  ;;  %s4366_s26 = smov 112   ;;  %s4367_s27 = smov 48  }
  0x13   :  { %58 = vadd.xlane.f32.xlu0 %v57_v5  ;;  %3942 = vmatpush3.msra.mxu1 %v101_v12  ;;  %v3714_v49 = vld [vmem:[%s4873_s7 + $0x4] ss:$0 sm:$0xff]  ;;  %s4368_s28 = smov 16   ;;  %vm1210_vm4 = vcmask 523264   ;;  %s4370_s0 = smov [#allocation5]  }
  0x14   :  { %v67_v8 = vsel %vm56_vm0, %v65_v6, 0.0  ;;  %v70_v10 = vsel %vm56_vm0, %v66_v7, 0.0  ;;  %3946 = vmatprep.subr.mxu1 %v192_v13 }
  0x15   :  { %68 = vadd.xlane.f32.xlu1 %v67_v8 }
  0x17   :  { %61 = vadd.xlane.f32.xlu0 %v60_v9 }
  0x19   :  { %71 = vadd.xlane.f32.xlu1 %v70_v10 }
  0x9c   :  { %v59_v14 = vpop.xlane.xlu0 %58 }
  0x9d   :  { %v63_v15 = vmul.f32 0.0625, %v59_v14 }
  0x9e   :  { %v69_v16 = vpop.xlane.xlu1 %68 }
  0x9f   :  { %v75_v17 = vmul.f32 %v63_v15, %v63_v15  ;;  %v73_v18 = vmul.f32 0.0625, %v69_v16  ;;  %v79_v28 = vsub.f32 %v54_v3, %v63_v15 }
  0xa0   :  { %v62_v19 = vpop.xlane.xlu0 %61 }
  0xa1   :  { %v77_v20 = vsub.f32 %v73_v18, %v75_v17  ;;  %v64_v21 = vmul.f32 0.0625, %v62_v19 }
  0xa2   :  { %v72_v22 = vpop.xlane.xlu1 %71 }
  0xa3   :  { %v81_v23 = vadd.f32 1e-12, %v77_v20  ;;  %v76_v24 = vmul.f32 %v64_v21, %v64_v21  ;;  %v74_v25 = vmul.f32 0.0625, %v72_v22  ;;  %v80_v33 = vsub.f32 %v55_v4, %v64_v21 }
  0xa5   :  { %4234 = vrsqrt.f32 %v81_v23  ;;  %v78_v26 = vsub.f32 %v74_v25, %v76_v24 }
  0xa7   :  { %v82_v27 = vadd.f32 1e-12, %v78_v26 }
  0xa9   :  { %4236 = vrsqrt.f32 %v82_v27 }
  0xb2   :  { %v4235_v29 = vpop.eup %4234 }
  0xb3   :  { %v85_v31 = vmul.f32 %v4235_v29, %v79_v28 }
  0xb5   :  { %v92_v34 = vmul.f32 %v3709_v30, %v85_v31 }
  0xb6   :  { %v4237_v35 = vpop.eup %4236 }
  0xb7   :  { %v86_v36 = vmul.f32 %v4237_v35, %v80_v33  ;;  %v99_v37 = vadd.f32 %v3710_v32, %v92_v34 }
  0xb9   :  { %v93_v38 = vmul.f32 %v3709_v30, %v86_v36  ;;  %3943 = vmatprep.mubr.msk.f32.mxu1 %vm56_vm0, %v99_v37 }
  0xbb   :  { %v100_v39 = vadd.f32 %v3710_v32, %v93_v38 }
  0xbd   :  { %3944 = vmatmul.mubr.msk.f32.vlgmr.msra.gmra.mxu1 %vm56_vm0, %v100_v39 }
  0xbe   :  { %3947 = vmatpush3.msra.mxu1 %v192_v13 }
  0xbf   :  { %3948 = vmatprep.subr.mxu1 %v191_v40 }
  0xc0   :  { %3949 = vmatpush3.msra.mxu1 %v191_v40  ;;  %v956_v40 = vld [vmem:[#allocation2 + $0x58] sm:$0xff] }
  0xc1   :  { %3950 = vmatprep.subr.mxu1 %v190_v41 }
  0xc2   :  { %3951 = vmatpush3.msra.mxu1 %v190_v41  ;;  %v955_v41 = vld [vmem:[#allocation2 + $0x50] sm:$0xff] }
  0xc3   :  { %3952 = vmatprep.subr.mxu1 %v189_v42 }
  0xc4   :  { %3953 = vmatpush3.msra.mxu1 %v189_v42 }
  0xc5   :  { %3967 = vmatprep.subr.mxu1 %v4361_v48 }
 0x17d   :  { %v3945_v43 = vpop.f32.mrf.mxu1 }
 0x17e   :  { %v4448_v47 = vadd.f32 %v3945_v43, %v3711_v44 }
 0x17f   :  { %v180_v45 = vpop.f32.mrf.mxu1 }
 0x180   :  { %v4446_v46 = vadd.f32 %v3711_v44, %v180_v45  ;;  %v954_v44 = vld [vmem:[#allocation2 + $0x48] sm:$0xff]  ;;  %v953_v45 = vld [vmem:[#allocation2 + $0x40] sm:$0xff] }
 0x182   :  { %3954 = vmatprep.mubr.msk.f32.mxu1 %vm198_vm1, %v4446_v46 }
 0x183   :  { %3955 = vmatmul.mubr.msk.f32.vlgmr.msra.gmra.mxu1 %vm198_vm1, %v4448_v47 }
 0x184   :  { %3969 = vmatprep.mubr.msk.f32.mxu1 %vm4362_vm2, %v4361_v48 }
 0x243   :  { %v3956_v50 = vpop.f32.mrf.mxu1 }
 0x244   :  { %v4463_v51 = vadd.f32 %v3956_v50, %v3714_v49 }
 0x245   :  { %v271_v52 = vpop.f32.mrf.mxu1 }
 0x246   :  { %v4465_v53 = vadd.f32 %v3714_v49, %v271_v52  ;;  %358 = vrot.lane.b32.xlu1 %v4463_v51, %s4363_s23 }
 0x248   :  { %281 = vrot.lane.b32.xlu0 %v4465_v53, %s4363_s23 }
 0x2b8   :  { %v359_v55 = vpop.permute.xlu1 %358 }
 0x2ba   :  { %v282_v54 = vpop.permute.xlu0 %281 }
 0x2bb   :  { %3958 = vmatpush3.xpose.msk.msra.mxu0 %vm56_vm0, %v282_v54 }
 0x2bc   :  { %3962 = vmatprep.subr.mxu0 %v4361_v48 }
 0x2be   :  { %3960 = vmatmul.mubr.msk.f32.vlgmr.msra.gmra.mxu0 %vm56_vm0, %v4465_v53 }
 0x2bf   :  { %3963 = vmatpush3.xpose.msk.msra.mxu0 %vm56_vm0, %v359_v55  ;;  %3964 = vmatprep.mubr.msk.f32.mxu0 %vm4362_vm2, %v4361_v48 }
 0x2c0   :  { %3972 = vmatprep.subr.mxu0 %v4361_v48 }
 0x2c2   :  { %3965 = vmatmul.mubr.msk.f32.vlgmr.msra.gmra.mxu0 %vm56_vm0, %v4463_v51 }
 0x2c3   :  { %3974 = vmatprep.mubr.msk.f32.mxu0 %vm4362_vm2, %v4361_v48 }
 0x37e   :  { %v353_v56 = vpop.f32.mrf.mxu0 }
 0x37f   :  { %v434_v57 = vmul.f32 0.25, %v353_v56 }
 0x380   :  { %v3961_v58 = vpop.f32.mrf.mxu0 }
 0x381   :  { %v437_v59 = vsel %vm436_vm3, %v434_v57, -inf }
 0x382   :  { %438 = vmax.xlane.f32.xlu1 %v437_v59  ;;  %v430_v60 = vpop.f32.mrf.mxu0 }
 0x383   :  { %v435_v61 = vmul.f32 0.25, %v430_v60 }
 0x384   :  { %v3966_v62 = vpop.f32.mrf.mxu0 }
 0x385   :  { %v440_v63 = vsel %vm436_vm3, %v435_v61, -inf }
 0x386   :  { %441 = vmax.xlane.f32.xlu0 %v440_v63 }
 0x393   :  { %533 = vrot.lane.b32.xlu1 %v4463_v51, %s4364_s24 }
 0x397   :  { %613 = vrot.lane.b32.xlu1 %v4465_v53, %s4365_s25 }
 0x39b   :  { %691 = vrot.lane.b32.xlu1 %v4463_v51, %s4365_s25 }
 0x39c   :  { %457 = vrot.lane.b32.xlu0 %v4465_v53, %s4364_s24 }
 0x39f   :  { %689 = vrot.lane.b32.xlu1 %v4463_v51, %s4366_s26 }
 0x3a0   :  { %611 = vrot.lane.b32.xlu0 %v4465_v53, %s4366_s26 }
 0x40b   :  { %v439_v0 = vpop.xlane.xlu1 %438 }
 0x40c   :  { %v443_v1 = vsub.f32 %v434_v57, %v439_v0 }
 0x40e   :  { %v445_v2 = vmul.f32 1.442695, %v443_v1 }
 0x40f   :  { %v534_v3 = vpop.permute.xlu1 %533  ;;  %v442_v4 = vpop.xlane.xlu0 %441 }
 0x410   :  { %4238 = vpow2.f32 %v445_v2  ;;  %v444_v5 = vsub.f32 %v435_v61, %v442_v4  ;;  %3973 = vmatpush3.msra.mxu0 %v534_v3  ;;  %v3729_v3 = vld [vmem:[%s4873_s7 + $0x5] ss:$0 sm:$0xff] }
 0x411   :  { %3982 = vmatprep.subr.mxu0 %v4361_v48 }
 0x412   :  { %v447_v6 = vmul.f32 1.442695, %v444_v5 }
 0x413   :  { %v458_v7 = vpop.permute.xlu0 %457  ;;  %v614_v8 = vpop.permute.xlu1 %613 }
 0x414   :  { %4240 = vpow2.f32 %v447_v6  ;;  %3968 = vmatpush3.msra.mxu1 %v458_v7 }
 0x415   :  { %3977 = vmatprep.subr.mxu1 %v4361_v48 }
 0x417   :  { %v692_v10 = vpop.permute.xlu1 %691  ;;  %v612_v12 = vpop.permute.xlu0 %611 }
 0x41b   :  { %v690_v13 = vpop.permute.xlu1 %689 }
 0x41d   :  { %v4239_v9 = vpop.eup %4238 }
 0x41e   :  { %3970 = vmatmul.mubr.msk.f32.vlgmr.msra.gmra.mxu1 %vm436_vm3, %v4239_v9  ;;  %v449_v37 = vsel %vm436_vm3, %v4239_v9, 0.0 }
 0x41f   :  { %3978 = vmatpush3.xpose.msk.msra.mxu1 %vm56_vm0, %v614_v8  ;;  %3979 = vmatprep.mubr.msk.f32.mxu1 %vm4362_vm2, %v4361_v48 }
 0x420   :  { %3987 = vmatprep.subr.mxu1 %v4361_v48 }
 0x421   :  { %v4241_v11 = vpop.eup %4240 }
 0x422   :  { %3975 = vmatmul.mubr.msk.f32.vlgmr.msra.gmra.mxu0 %vm436_vm3, %v4241_v11  ;;  %3980 = vmatmul.mubr.msk.f32.vlgmr.msra.gmra.mxu1 %vm56_vm0, %v612_v12  ;;  %v452_v39 = vsel %vm436_vm3, %v4241_v11, 0.0 }
 0x423   :  { %3983 = vmatpush3.xpose.msk.msra.mxu0 %vm56_vm0, %v692_v10  ;;  %3984 = vmatprep.mubr.msk.f32.mxu0 %vm4362_vm2, %v4361_v48 }
 0x424   :  { %3992 = vmatprep.subr.mxu0 %v4361_v48  ;;  %3989 = vmatprep.mubr.msk.f32.mxu1 %vm4362_vm2, %v4361_v48 }
 0x426   :  { %3985 = vmatmul.mubr.msk.f32.vlgmr.msra.gmra.mxu0 %vm56_vm0, %v690_v13 }
 0x427   :  { %3994 = vmatprep.mubr.msk.f32.mxu0 %vm4362_vm2, %v4361_v48 }
 0x4de   :  { %v4515_v14 = vpop.f32.mrf.mxu1 }
 0x4e0   :  { %v3971_v15 = vpop.f32.mrf.mxu1 }
 0x4e2   :  { %v4517_v16 = vpop.f32.mrf.mxu0  ;;  %v685_v17 = vpop.f32.mrf.mxu1 }
 0x4e3   :  { %v767_v18 = vmul.f32 0.25, %v685_v17  ;;  %v1091_v17 = vld [vmem:[#allocation2 + $0x70] sm:$0xff] }
 0x4e4   :  { %v3976_v19 = vpop.f32.mrf.mxu0  ;;  %v3981_v20 = vpop.f32.mrf.mxu1 }
 0x4e5   :  { %v769_v21 = vsel %vm436_vm3, %v767_v18, -inf }
 0x4e6   :  { %770 = vmax.xlane.f32.xlu0 %v769_v21  ;;  %v763_v22 = vpop.f32.mrf.mxu0 }
 0x4e7   :  { %v768_v23 = vmul.f32 0.25, %v763_v22 }
 0x4e8   :  { %v3986_v24 = vpop.f32.mrf.mxu0 }
 0x4e9   :  { %v772_v25 = vsel %vm436_vm3, %v768_v23, -inf }
 0x4ea   :  { %773 = vmax.xlane.f32.xlu1 %v772_v25 }
 0x4fb   :  { %865 = vrot.lane.b32.xlu1 %v4463_v51, %s4367_s27 }
 0x4fc   :  { %789 = vrot.lane.b32.xlu0 %v4465_v53, %s4367_s27 }
 0x56f   :  { %v771_v26 = vpop.xlane.xlu0 %770 }
 0x570   :  { %v775_v27 = vsub.f32 %v767_v18, %v771_v26  ;;  %v1339_v18 = vld [vmem:[#allocation2 + $0x18] sm:$0xff] }
 0x572   :  { %v777_v28 = vmul.f32 1.442695, %v775_v27 }
 0x573   :  { %v790_v29 = vpop.permute.xlu0 %789  ;;  %v774_v30 = vpop.xlane.xlu1 %773 }
 0x574   :  { %4242 = vpow2.f32 %v777_v28  ;;  %v776_v31 = vsub.f32 %v768_v23, %v774_v30  ;;  %3988 = vmatpush3.msra.mxu1 %v790_v29 }
 0x575   :  { %3997 = vmatprep.subr.mxu1 %v956_v40 }
 0x576   :  { %v779_v32 = vmul.f32 1.442695, %v776_v31 }
 0x577   :  { %v866_v33 = vpop.permute.xlu1 %865 }
 0x578   :  { %4244 = vpow2.f32 %v779_v32  ;;  %3993 = vmatpush3.msra.mxu0 %v866_v33 }
 0x581   :  { %v4243_v34 = vpop.eup %4242 }
 0x582   :  { %3990 = vmatmul.mubr.msk.f32.vlgmr.msra.gmra.mxu1 %vm436_vm3, %v4243_v34  ;;  %v781_v35 = vsel %vm436_vm3, %v4243_v34, 0.0 }
 0x583   :  { %782 = vadd.xlane.f32.xlu0 %v781_v35  ;;  %3998 = vmatpush3.msra.mxu1 %v956_v40  ;;  %v3732_v35 = vld [vmem:[%s4873_s7 + $0x6] ss:$0 sm:$0xff] }
 0x584   :  { %3999 = vmatprep.subr.mxu1 %v955_v41 }
 0x585   :  { %v4245_v36 = vpop.eup %4244  ;;  %4000 = vmatpush3.msra.mxu1 %v955_v41 }
 0x586   :  { %3995 = vmatmul.mubr.msk.f32.vlgmr.msra.gmra.mxu0 %vm436_vm3, %v4245_v36  ;;  %v784_v38 = vsel %vm436_vm3, %v4245_v36, 0.0  ;;  %4001 = vmatprep.subr.mxu1 %v954_v44 }
 0x587   :  { %450 = vadd.xlane.f32.xlu0 %v449_v37  ;;  %785 = vadd.xlane.f32.xlu1 %v784_v38 }
 0x588   :  { %4002 = vmatpush3.msra.mxu1 %v954_v44 }
 0x589   :  { %4003 = vmatprep.subr.mxu1 %v953_v45 }
 0x58a   :  { %4004 = vmatpush3.msra.mxu1 %v953_v45  ;;  %v47_v45 = vld [vmem:[%s4868_s2] sm:$0xff] }
 0x58b   :  { %453 = vadd.xlane.f32.xlu0 %v452_v39  ;;  %v3733_v39 = vld [vmem:[%s4873_s7 + $0x7] ss:$0 sm:$0xff] }
 0x60c   :  { %v783_v42 = vpop.xlane.xlu0 %782 }
 0x60d   :  { %4246 = vrcp.f32 %v783_v42 }
 0x610   :  { %v786_v43 = vpop.xlane.xlu1 %785  ;;  %v451_v57 = vpop.xlane.xlu0 %450 }
 0x611   :  { %4248 = vrcp.f32 %v786_v43 }
 0x612   :  { %4250 = vrcp.f32 %v451_v57  ;;  %v1202_v57 = vld [vmem:[#allocation2 + $0xa8] sm:$0xff] }
 0x614   :  { %v454_v58 = vpop.xlane.xlu0 %453 }
 0x615   :  { %4252 = vrcp.f32 %v454_v58  ;;  %v1201_v58 = vld [vmem:[#allocation2 + $0xa0] sm:$0xff] }
 0x61a   :  { %v4247_v49 = vpop.eup %4246 }
 0x61e   :  { %v4249_v53 = vpop.eup %4248 }
 0x61f   :  { %v4251_v59 = vpop.eup %4250 }
 0x620   :  { %v609_v60 = vmul.f32 %v4251_v59, %v4515_v14  ;;  %v1200_v59 = vld [vmem:[#allocation2 + $0x98] sm:$0xff] }
 0x622   :  { %v4253_v61 = vpop.eup %4252 }
 0x623   :  { %v610_v0 = vmul.f32 %v4253_v61, %v4517_v16  ;;  %v1092_v16 = vld [vmem:[#allocation2 + $0x78] sm:$0xff]  ;;  %v1198_v61 = vld [vmem:[#allocation2 + $0x88] sm:$0xff] }
 0x624   :  { %4008 = vmatprep.subr.mxu0 %v1092_v16 }
 0x625   :  { %4009 = vmatpush3.msra.mxu0 %v1092_v16 }
 0x626   :  { %4010 = vmatprep.subr.mxu0 %v1091_v17 }
 0x627   :  { %4011 = vmatpush3.msra.mxu0 %v1091_v17 }
 0x642   :  { %v861_v50 = vpop.f32.mrf.mxu1 }
 0x643   :  { %v941_v51 = vmul.f32 %v4247_v49, %v861_v50  ;;  %v1338_v49 = vld [vmem:[#allocation2 + $0x10] sm:$0xff]  ;;  %v48_v50 = vld [vmem:[%s4868_s2 + $0x8] sm:$0xff]  ;;  %s3697_s2 = sshll.u32 %s4370_s0, 4  ;;  %s3698_s2 = int_to_ptr.vmem [resolvable:$true] %s3697_s2 }
 0x644   :  { %v3991_v52 = vpop.f32.mrf.mxu1  ;;  %s4334_s1 = scalar_lea.vmem %s3698_s2, 256  ;;  %p4339_p6 = scmp.lt.s32.totalorder %s3698_s2, %s3698_s2 }
 0x645   :  { %945 = vrot.lane.b32.xlu0 %v941_v51, %s4368_s28  ;;  %v1451_v51 = vld [vmem:[#allocation2 + $0xd8] sm:$0xff]  ;;  %v1450_v52 = vld [vmem:[#allocation2 + $0xd0] sm:$0xff]  ;;  %p4335_p5 = scmp.ne.s32.totalorder %s3698_s2, %s4334_s1  ;;  %p4340_p7 = scmp.lt.s32.totalorder %s4334_s1, %s4334_s1 }
 0x646   :  { %v937_v54 = vpop.f32.mrf.mxu0 }
 0x647   :  { %v942_v55 = vmul.f32 %v4249_v53, %v937_v54  ;;  %v1449_v53 = vld [vmem:[#allocation2 + $0xc8] sm:$0xff]  ;;  %v1448_v54 = vld [vmem:[#allocation2 + $0xc0] sm:$0xff]  ;;  %p4341_p8 = por %p4340_p7, %p4339_p6 }
 0x648   :  { %v3996_v56 = vpop.f32.mrf.mxu0 }
 0x649   :  { %947 = vrot.lane.b32.xlu1 %v942_v55, %s4368_s28  ;;  %v1204_v55 = vld [vmem:[#allocation2 + $0xb8] sm:$0xff]  ;;  %v1203_v56 = vld [vmem:[#allocation2 + $0xb0] sm:$0xff]  ;;  %p4342_p9 = pnand %p4341_p8, %p4335_p5 }
 0x64a   :  { %4019 = vmatprep.subr.mxu1 %v1204_v55 }
 0x6b7   :  { %v946_v62 = vpop.permute.xlu0 %945 }
 0x6b8   :  { %v951_v63 = vsel %vm56_vm0, %v609_v60, %v946_v62  ;;  %v1199_v60 = vld [vmem:[#allocation2 + $0x90] sm:$0xff]  ;;  %v1197_v62 = vld [vmem:[#allocation2 + $0x80] sm:$0xff] }
 0x6b9   :  { %4005 = vmatprep.mubr.msk.f32.mxu1 %vm198_vm1, %v951_v63  ;;  %v3734_v63 = vld [vmem:[%s4873_s7 + $0x8] ss:$0 sm:$0xff] }
 0x6bb   :  { %v948_v1 = vpop.permute.xlu1 %947 }
 0x6bc   :  { %v952_v2 = vsel %vm56_vm0, %v610_v0, %v948_v1 }
 0x6bd   :  { %4006 = vmatmul.mubr.msk.f32.vlgmr.msra.gmra.mxu1 %vm198_vm1, %v952_v2 }
 0x6be   :  { %4020 = vmatpush3.msra.mxu1 %v1204_v55 }
 0x6bf   :  { %4021 = vmatprep.subr.mxu1 %v1203_v56 }
 0x6c0   :  { %4022 = vmatpush3.msra.mxu1 %v1203_v56 }
 0x6c1   :  { %4023 = vmatprep.subr.mxu1 %v1202_v57 }
 0x6c2   :  { %4024 = vmatpush3.msra.mxu1 %v1202_v57 }
 0x6c3   :  { %4025 = vmatprep.subr.mxu1 %v1201_v58 }
 0x6c4   :  { %4026 = vmatpush3.msra.mxu1 %v1201_v58 }
 0x6c5   :  { %4027 = vmatprep.subr.mxu1 %v1200_v59 }
 0x6c6   :  { %4028 = vmatpush3.msra.mxu1 %v1200_v59 }
 0x6c7   :  { %4029 = vmatprep.subr.mxu1 %v1199_v60 }
 0x6c8   :  { %4030 = vmatpush3.msra.mxu1 %v1199_v60 }
 0x6c9   :  { %4031 = vmatprep.subr.mxu1 %v1198_v61 }
 0x6ca   :  { %4032 = vmatpush3.msra.mxu1 %v1198_v61 }
 0x6cb   :  { %4033 = vmatprep.subr.mxu1 %v1197_v62 }
 0x6cc   :  { %4034 = vmatpush3.msra.mxu1 %v1197_v62 }
 0x6cd   :  { %4061 = vmatprep.subr.mxu1 %v4361_v48 }
 0x77d   :  { %v4007_v4 = vpop.f32.mrf.mxu1 }
 0x77e   :  { %v1040_v5 = vadd.f32 %v4007_v4, %v3729_v3 }
 0x77f   :  { %v1034_v6 = vpop.f32.mrf.mxu1 }
 0x780   :  { %v1044_v7 = vadd.f32 %v1040_v5, %v4448_v47  ;;  %v1035_v8 = vadd.f32 %v3729_v3, %v1034_v6  ;;  %v1090_v47 = vld [vmem:[#allocation2 + $0x68] sm:$0xff]  ;;  %v3742_v5 = vld [vmem:[%s4873_s7 + $0x3] ss:$0 sm:$0xff] }
 0x781   :  { %4012 = vmatprep.subr.mxu0 %v1090_v47 }
 0x782   :  { %v1043_v9 = vadd.f32 %v1035_v8, %v4446_v46  ;;  %v1048_v10 = vsel %vm198_vm1, %v1044_v7, 0.0  ;;  %v1054_v13 = vmul.f32 %v1044_v7, %v1044_v7  ;;  %v1089_v46 = vld [vmem:[#allocation2 + $0x60] sm:$0xff]  ;;  %4013 = vmatpush3.msra.mxu0 %v1090_v47 }
 0x783   :  { %1049 = vadd.xlane.f32.xlu0 %v1048_v10  ;;  %4014 = vmatprep.subr.mxu0 %v1089_v46 }
 0x784   :  { %v1045_v11 = vsel %vm198_vm1, %v1043_v9, 0.0  ;;  %v1053_v12 = vmul.f32 %v1043_v9, %v1043_v9  ;;  %v1058_v15 = vsel %vm198_vm1, %v1054_v13, 0.0  ;;  %4015 = vmatpush3.msra.mxu0 %v1089_v46  ;;  %v49_v13 = vld [vmem:[%s4869_s3] sm:$0xff] }
 0x785   :  { %1046 = vadd.xlane.f32.xlu1 %v1045_v11  ;;  %4038 = vmatprep.subr.mxu0 %v1339_v18 }
 0x786   :  { %v1055_v14 = vsel %vm198_vm1, %v1053_v12, 0.0 }
 0x787   :  { %1056 = vadd.xlane.f32.xlu0 %v1055_v14 }
 0x789   :  { %1059 = vadd.xlane.f32.xlu1 %v1058_v15 }
 0x80c   :  { %v1050_v19 = vpop.xlane.xlu0 %1049 }
 0x80d   :  { %v1052_v21 = vmul.f32 0.03125, %v1050_v19 }
 0x80e   :  { %v1047_v20 = vpop.xlane.xlu1 %1046 }
 0x80f   :  { %v1051_v22 = vmul.f32 0.03125, %v1047_v20  ;;  %v1064_v27 = vmul.f32 %v1052_v21, %v1052_v21  ;;  %v1068_v36 = vsub.f32 %v1044_v7, %v1052_v21 }
 0x810   :  { %v1057_v23 = vpop.xlane.xlu0 %1056 }
 0x811   :  { %v1063_v24 = vmul.f32 %v1051_v22, %v1051_v22  ;;  %v1061_v25 = vmul.f32 0.03125, %v1057_v23  ;;  %v1067_v33 = vsub.f32 %v1043_v9, %v1051_v22 }
 0x812   :  { %v1060_v26 = vpop.xlane.xlu1 %1059 }
 0x813   :  { %v1065_v28 = vsub.f32 %v1061_v25, %v1063_v24  ;;  %v1062_v29 = vmul.f32 0.03125, %v1060_v26 }
 0x815   :  { %v1069_v30 = vadd.f32 1e-12, %v1065_v28  ;;  %v1066_v31 = vsub.f32 %v1062_v29, %v1064_v27  ;;  %v3747_v28 = vld [vmem:[%s4873_s7 + $0xc] ss:$0 sm:$0xff] }
 0x817   :  { %4254 = vrsqrt.f32 %v1069_v30  ;;  %v1070_v32 = vadd.f32 1e-12, %v1066_v31 }
 0x819   :  { %4256 = vrsqrt.f32 %v1070_v32 }
 0x824   :  { %v4255_v34 = vpop.eup %4254 }
 0x825   :  { %v1073_v37 = vmul.f32 %v4255_v34, %v1067_v33 }
 0x826   :  { %v4257_v38 = vpop.eup %4256 }
 0x827   :  { %v1074_v40 = vmul.f32 %v4257_v38, %v1068_v36  ;;  %v1080_v41 = vmul.f32 %v3732_v35, %v1073_v37  ;;  %v1428_v36 = vlaneseq }
 0x829   :  { %v1081_v42 = vmul.f32 %v3732_v35, %v1074_v40  ;;  %v4554_v43 = vadd.f32 %v3733_v39, %v1080_v41  ;;  %v1429_v37 = vshrl.u32 %v1428_v36, 7  ;;  %v1431_v38 = vand.u32 127, %v1428_v36  ;;  %v3746_v40 = vld [vmem:[%s4871_s5 + $0x1] ss:$0 sm:$0xff] }
 0x82a   :  { %v4369_v41 = vmov -1e+09  }
 0x82b   :  { %v4556_v44 = vadd.f32 %v3733_v39, %v1081_v42  ;;  %4016 = vmatprep.mubr.msk.f32.mxu0 %vm198_vm1, %v4554_v43  ;;  %vm1432_vm5 = vcmp.le.s32.totalorder %v1431_v38, %v1429_v37 }
 0x82c   :  { %v1433_v42 = vsel %vm1432_vm5, 0.0, %v4369_v41  ;;  %v2216_v41 = vld [vmem:[#allocation2 + $0xf0] sm:$0xff] }
 0x82d   :  { %4017 = vmatmul.mubr.msk.f32.vlgmr.msra.gmra.mxu0 %vm198_vm1, %v4556_v44 }
 0x82e   :  { %4039 = vmatpush3.msra.mxu0 %v1339_v18  ;;  %4042 = vmatprep.mubr.msk.f32.mxu0 %vm56_vm0, %v47_v45 }
 0x82f   :  { %4040 = vmatprep.subr.mxu0 %v1338_v49 }
 0x830   :  { %4041 = vmatpush3.msra.mxu0 %v1338_v49  ;;  %v3745_v49 = vld [vmem:[%s4871_s5] ss:$0 sm:$0xff] }
 0x831   :  { %4043 = vmatmul.mubr.msk.f32.vlgmr.msra.gmra.mxu0 %vm56_vm0, %v48_v50  ;;  %4045 = vmatprep.subr.mxu0 %v1451_v51  ;;  %v1447_v50 = vadd.f32 %v3746_v40, %v1433_v42  ;;  %v2217_v40 = vld [vmem:[#allocation2 + $0xf8] sm:$0xff] }
 0x832   :  { %4046 = vmatpush3.msra.mxu0 %v1451_v51 }
 0x833   :  { %4047 = vmatprep.subr.mxu0 %v1450_v52 }
 0x834   :  { %4048 = vmatpush3.msra.mxu0 %v1450_v52 }
 0x835   :  { %4049 = vmatprep.subr.mxu0 %v1449_v53 }
 0x836   :  { %4050 = vmatpush3.msra.mxu0 %v1449_v53  ;;  %v1446_v53 = vadd.f32 %v3745_v49, %v1433_v42 }
 0x837   :  { %4051 = vmatprep.subr.mxu0 %v1448_v54 }
 0x838   :  { %4052 = vmatpush3.msra.mxu0 %v1448_v54 }
 0x839   :  { %4056 = vmatprep.subr.mxu0 %v4361_v48 }
 0x8ed   :  { %v4018_v0 = vpop.f32.mrf.mxu0 }
 0x8ee   :  { %v1176_v1 = vadd.f32 %v4018_v0, %v3734_v63 }
 0x8ef   :  { %v1170_v2 = vpop.f32.mrf.mxu0 }
 0x8f0   :  { %v1180_v3 = vmul.f32 %v1176_v1, %v1176_v1  ;;  %v1171_v4 = vadd.f32 %v3734_v63, %v1170_v2 }
 0x8f1   :  { %v4044_v6 = vpop.f32.mrf.mxu0 }
 0x8f2   :  { %v1182_v7 = vmul.f32 %v1180_v3, %v1176_v1  ;;  %v1179_v8 = vmul.f32 %v1171_v4, %v1171_v4  ;;  %v1423_v9 = vadd.f32 %v4044_v6, %v3742_v5 }
 0x8f3   :  { %v1417_v10 = vpop.f32.mrf.mxu0 }
 0x8f4   :  { %v1184_v11 = vmul.f32 0.044715, %v1182_v7  ;;  %v1181_v12 = vmul.f32 %v1179_v8, %v1171_v4  ;;  %v1418_v14 = vadd.f32 %v3742_v5, %v1417_v10  ;;  %v4583_v47 = vadd.f32 %v1423_v9, %v49_v13 }
 0x8f6   :  { %v1186_v15 = vadd.f32 %v1184_v11, %v1176_v1  ;;  %v1183_v16 = vmul.f32 0.044715, %v1181_v12  ;;  %v4581_v17 = vadd.f32 %v1418_v14, %v49_v13 }
 0x8f8   :  { %v1188_v46 = vmul.f32 0.7978846, %v1186_v15  ;;  %v1185_v18 = vadd.f32 %v1183_v16, %v1171_v4  ;;  %4053 = vmatprep.mubr.msk.f32.mxu0 %vm198_vm1, %v4581_v17 }
 0x8f9   :  { %4054 = vmatmul.mubr.msk.f32.vlgmr.msra.gmra.mxu0 %vm198_vm1, %v4583_v47 }
 0x8fa   :  { %4258 = vtanh.f32 %v1188_v46  ;;  %v1187_v19 = vmul.f32 0.7978846, %v1185_v18  ;;  %4058 = vmatprep.mubr.msk.f32.mxu0 %vm4362_vm2, %v4361_v48 }
 0x8fc   :  { %4260 = vtanh.f32 %v1187_v19 }
 0x907   :  { %v4259_v20 = vpop.eup %4258 }
 0x908   :  { %v1192_v21 = vadd.f32 1.0, %v4259_v20 }
 0x909   :  { %v4261_v22 = vpop.eup %4260 }
 0x90a   :  { %v1191_v23 = vadd.f32 1.0, %v4261_v22  ;;  %v1194_v24 = vmul.f32 0.5, %v1192_v21 }
 0x90c   :  { %v1193_v25 = vmul.f32 0.5, %v1191_v23  ;;  %v1196_v27 = vmul.f32 %v1194_v24, %v1176_v1 }
 0x90e   :  { %v1195_v26 = vmul.f32 %v1193_v25, %v1171_v4 }
 0x910   :  { %4035 = vmatprep.mubr.msk.f32.mxu1 %vm1210_vm4, %v1195_v26 }
 0x911   :  { %4036 = vmatmul.mubr.msk.f32.vlgmr.msra.gmra.mxu1 %vm1210_vm4, %v1196_v27 }
 0x912   :  { %4063 = vmatprep.mubr.msk.f32.mxu1 %vm4362_vm2, %v4361_v48 }
 0x9b9   :  { %v4055_v29 = vpop.f32.mrf.mxu0 }
 0x9ba   :  { %v4598_v30 = vadd.f32 %v4055_v29, %v3747_v28 }
 0x9bb   :  { %v1529_v31 = vpop.f32.mrf.mxu0 }
 0x9bc   :  { %v4600_v32 = vadd.f32 %v3747_v28, %v1529_v31  ;;  %1616 = vrot.lane.b32.xlu1 %v4598_v30, %s4363_s23 }
 0x9be   :  { %1539 = vrot.lane.b32.xlu0 %v4600_v32, %s4363_s23 }
 0x9c0   :  { %1792 = vrot.lane.b32.xlu1 %v4598_v30, %s4364_s24 }
 0x9c4   :  { %1872 = vrot.lane.b32.xlu1 %v4600_v32, %s4365_s25 }
 0x9c8   :  { %1950 = vrot.lane.b32.xlu1 %v4598_v30, %s4365_s25 }
 0x9d1   :  { %v4625_v39 = vpop.f32.mrf.mxu1 }
 0x9d3   :  { %v4630_v45 = vpop.f32.mrf.mxu1 }
 0xa2e   :  { %v1617_v33 = vpop.permute.xlu1 %1616 }
 0xa2f   :  { %4062 = vmatpush3.xpose.msk.msra.mxu1 %vm56_vm0, %v1617_v33 }
 0xa30   :  { %v1540_v34 = vpop.permute.xlu0 %1539  ;;  %4071 = vmatprep.subr.mxu1 %v4361_v48 }
 0xa31   :  { %4057 = vmatpush3.xpose.msk.msra.mxu0 %vm56_vm0, %v1540_v34 }
 0xa32   :  { %v1793_v35 = vpop.permute.xlu1 %1792  ;;  %4064 = vmatmul.mubr.msk.f32.vlgmr.msra.gmra.mxu1 %vm56_vm0, %v4598_v30  ;;  %4066 = vmatprep.subr.mxu0 %v4361_v48 }
 0xa33   :  { %4072 = vmatpush3.msra.mxu1 %v1793_v35  ;;  %4073 = vmatprep.mubr.msk.f32.mxu1 %vm4362_vm2, %v4361_v48 }
 0xa34   :  { %4059 = vmatmul.mubr.msk.f32.vlgmr.msra.gmra.mxu0 %vm56_vm0, %v4600_v32  ;;  %4081 = vmatprep.subr.mxu1 %v4361_v48 }
 0xa35   :  { %4068 = vmatprep.mubr.msk.f32.mxu0 %vm4362_vm2, %v4361_v48 }
 0xa36   :  { %v1873_v62 = vpop.permute.xlu1 %1872 }
 0xa3a   :  { %v1951_v63 = vpop.permute.xlu1 %1950 }
 0xaf2   :  { %v1688_v51 = vpop.f32.mrf.mxu1 }
 0xaf3   :  { %v1693_v52 = vmul.f32 0.25, %v1688_v51  ;;  %v2214_v51 = vld [vmem:[#allocation2 + $0xe0] sm:$0xff] }
 0xaf4   :  { %v1611_v54 = vpop.f32.mrf.mxu0  ;;  %v4065_v55 = vpop.f32.mrf.mxu1 }
 0xaf5   :  { %v1692_v56 = vmul.f32 0.25, %v1611_v54  ;;  %v1695_v57 = vadd.f32 %v1693_v52, %v1447_v50 }
 0xaf6   :  { %v4060_v58 = vpop.f32.mrf.mxu0 }
 0xaf7   :  { %v1699_v59 = vsel %vm436_vm3, %v1695_v57, -inf  ;;  %v1694_v60 = vadd.f32 %v1692_v56, %v1446_v53 }
 0xaf8   :  { %1700 = vmax.xlane.f32.xlu0 %v1699_v59 }
 0xaf9   :  { %v1696_v61 = vsel %vm436_vm3, %v1694_v60, -inf }
 0xafa   :  { %1697 = vmax.xlane.f32.xlu1 %v1696_v61 }
 0xb0b   :  { %1948 = vrot.lane.b32.xlu1 %v4598_v30, %s4366_s26 }
 0xb0e   :  { %1716 = vrot.lane.b32.xlu0 %v4600_v32, %s4364_s24 }
 0xb12   :  { %1870 = vrot.lane.b32.xlu0 %v4600_v32, %s4366_s26 }
 0xb81   :  { %v1701_v0 = vpop.xlane.xlu0 %1700 }
 0xb82   :  { %v1703_v1 = vsub.f32 %v1695_v57, %v1701_v0 }
 0xb83   :  { %v1698_v2 = vpop.xlane.xlu1 %1697 }
 0xb84   :  { %v1706_v3 = vmul.f32 1.442695, %v1703_v1  ;;  %v1702_v4 = vsub.f32 %v1694_v60, %v1698_v2  ;;  %v3737_v60 = vld [vmem:[%s4873_s7 + $0x9] ss:$0 sm:$0xff] }
 0xb85   :  { %v1717_v5 = vpop.permute.xlu0 %1716  ;;  %v1289_v61 = vadd.f32 %v4625_v39, %v3737_v60 }
 0xb86   :  { %4262 = vpow2.f32 %v1706_v3  ;;  %v1704_v6 = vmul.f32 1.442695, %v1702_v4  ;;  %4067 = vmatpush3.msra.mxu0 %v1717_v5 }
 0xb87   :  { %4076 = vmatprep.subr.mxu0 %v4361_v48  ;;  %v1949_v9 = vpop.permute.xlu1 %1948 }
 0xb88   :  { %4264 = vpow2.f32 %v1704_v6 }
 0xb89   :  { %v1871_v10 = vpop.permute.xlu0 %1870 }
 0xb93   :  { %v4263_v7 = vpop.eup %4262 }
 0xb94   :  { %4074 = vmatmul.mubr.msk.f32.vlgmr.msra.gmra.mxu1 %vm436_vm3, %v4263_v7  ;;  %v1711_v38 = vsel %vm436_vm3, %v4263_v7, 0.0 }
 0xb95   :  { %v4265_v8 = vpop.eup %4264  ;;  %4082 = vmatpush3.xpose.msk.msra.mxu1 %vm56_vm0, %v1951_v63  ;;  %4083 = vmatprep.mubr.msk.f32.mxu1 %vm4362_vm2, %v4361_v48  ;;  %v4684_v63 = vadd.f32 %v1289_v61, %v4556_v44  ;;  %v2443_v44 = vld [vmem:[#allocation2 + $0x138] sm:$0xff] }
 0xb96   :  { %4069 = vmatmul.mubr.msk.f32.vlgmr.msra.gmra.mxu0 %vm436_vm3, %v4265_v8  ;;  %4091 = vmatprep.subr.mxu1 %v4361_v48  ;;  %v1708_v37 = vsel %vm436_vm3, %v4265_v8, 0.0 }
 0xb97   :  { %4077 = vmatpush3.xpose.msk.msra.mxu0 %vm56_vm0, %v1873_v62  ;;  %4078 = vmatprep.mubr.msk.f32.mxu0 %vm4362_vm2, %v4361_v48  ;;  %v1284_v62 = vadd.f32 %v3737_v60, %v4630_v45  ;;  %v1297_v1 = vsel %vm198_vm1, %v4684_v63, 0.0  ;;  %v1303_v4 = vmul.f32 %v4684_v63, %v4684_v63 }
 0xb98   :  { %4084 = vmatmul.mubr.msk.f32.vlgmr.msra.gmra.mxu1 %vm56_vm0, %v1949_v9  ;;  %4086 = vmatprep.subr.mxu0 %v4361_v48 }
 0xb99   :  { %4093 = vmatprep.mubr.msk.f32.mxu1 %vm4362_vm2, %v4361_v48  ;;  %v1292_v0 = vadd.f32 %v1284_v62, %v4554_v43  ;;  %v1307_v45 = vsel %vm198_vm1, %v1303_v4, 0.0 }
 0xb9a   :  { %4079 = vmatmul.mubr.msk.f32.vlgmr.msra.gmra.mxu0 %vm56_vm0, %v1871_v10 }
 0xb9b   :  { %4088 = vmatprep.mubr.msk.f32.mxu0 %vm4362_vm2, %v4361_v48  ;;  %v1302_v2 = vmul.f32 %v1292_v0, %v1292_v0  ;;  %v1294_v3 = vsel %vm198_vm1, %v1292_v0, 0.0 }
 0xb9d   :  { %v1304_v39 = vsel %vm198_vm1, %v1302_v2, 0.0 }
 0xc54   :  { %v4660_v11 = vpop.f32.mrf.mxu1 }
 0xc56   :  { %v4662_v12 = vpop.f32.mrf.mxu0  ;;  %v4075_v13 = vpop.f32.mrf.mxu1 }
 0xc58   :  { %v4070_v14 = vpop.f32.mrf.mxu0  ;;  %v2022_v15 = vpop.f32.mrf.mxu1 }
 0xc59   :  { %v2027_v16 = vmul.f32 0.25, %v2022_v15 }
 0xc5a   :  { %v1944_v46 = vpop.f32.mrf.mxu0  ;;  %v4085_v18 = vpop.f32.mrf.mxu1 }
 0xc5b   :  { %v2026_v19 = vmul.f32 0.25, %v1944_v46  ;;  %v2029_v20 = vadd.f32 %v2027_v16, %v1447_v50  ;;  %v2215_v50 = vld [vmem:[#allocation2 + $0xe8] sm:$0xff]  ;;  %v2442_v16 = vld [vmem:[#allocation2 + $0x130] sm:$0xff]  ;;  %v2440_v18 = vld [vmem:[#allocation2 + $0x120] sm:$0xff] }
 0xc5c   :  { %v4080_v21 = vpop.f32.mrf.mxu0  ;;  %v2441_v46 = vld [vmem:[#allocation2 + $0x128] sm:$0xff] }
 0xc5d   :  { %v2033_v22 = vsel %vm436_vm3, %v2029_v20, -inf  ;;  %v2028_v23 = vadd.f32 %v2026_v19, %v1446_v53 }
 0xc5e   :  { %2034 = vmax.xlane.f32.xlu1 %v2033_v22 }
 0xc5f   :  { %v2030_v24 = vsel %vm436_vm3, %v2028_v23, -inf }
 0xc60   :  { %2031 = vmax.xlane.f32.xlu0 %v2030_v24 }
 0xc6f   :  { %2126 = vrot.lane.b32.xlu1 %v4598_v30, %s4367_s27 }
 0xc76   :  { %2050 = vrot.lane.b32.xlu0 %v4600_v32, %s4367_s27 }
 0xce7   :  { %v2035_v25 = vpop.xlane.xlu1 %2034 }
 0xce8   :  { %v2037_v26 = vsub.f32 %v2029_v20, %v2035_v25 }
 0xce9   :  { %v2032_v27 = vpop.xlane.xlu0 %2031 }
 0xcea   :  { %v2040_v28 = vmul.f32 1.442695, %v2037_v26  ;;  %v2036_v29 = vsub.f32 %v2028_v23, %v2032_v27 }
 0xceb   :  { %v2127_v31 = vpop.permute.xlu1 %2126 }
 0xcec   :  { %4266 = vpow2.f32 %v2040_v28  ;;  %v2038_v33 = vmul.f32 1.442695, %v2036_v29  ;;  %4092 = vmatpush3.msra.mxu1 %v2127_v31 }
 0xced   :  { %v2051_v34 = vpop.permute.xlu0 %2050 }
 0xcee   :  { %4268 = vpow2.f32 %v2038_v33  ;;  %4087 = vmatpush3.msra.mxu0 %v2051_v34 }
 0xcef   :  { %4096 = vmatprep.subr.mxu0 %v2217_v40 }
 0xcf9   :  { %v4267_v35 = vpop.eup %4266 }
 0xcfa   :  { %4094 = vmatmul.mubr.msk.f32.vlgmr.msra.gmra.mxu1 %vm436_vm3, %v4267_v35  ;;  %v2045_v30 = vsel %vm436_vm3, %v4267_v35, 0.0  ;;  %v3740_v35 = vld [vmem:[%s4873_s7 + $0xa] ss:$0 sm:$0xff] }
 0xcfb   :  { %v4269_v36 = vpop.eup %4268  ;;  %2046 = vadd.xlane.f32.xlu1 %v2045_v30 }
 0xcfc   :  { %4089 = vmatmul.mubr.msk.f32.vlgmr.msra.gmra.mxu0 %vm436_vm3, %v4269_v36  ;;  %v2042_v32 = vsel %vm436_vm3, %v4269_v36, 0.0 }
 0xcfd   :  { %2043 = vadd.xlane.f32.xlu0 %v2042_v32  ;;  %4097 = vmatpush3.msra.mxu0 %v2217_v40 }
 0xcfe   :  { %4098 = vmatprep.subr.mxu0 %v2216_v41 }
 0xcff   :  { %4099 = vmatpush3.msra.mxu0 %v2216_v41 }
 0xd00   :  { %4100 = vmatprep.subr.mxu0 %v2215_v50 }
 0xd01   :  { %1709 = vadd.xlane.f32.xlu0 %v1708_v37  ;;  %4101 = vmatpush3.msra.mxu0 %v2215_v50  ;;  %v3741_v37 = vld [vmem:[%s4873_s7 + $0xb] ss:$0 sm:$0xff]  ;;  %v3762_v50 = vld [vmem:[%s4873_s7 + $0xd] ss:$0 sm:$0xff] }
 0xd02   :  { %4102 = vmatprep.subr.mxu0 %v2214_v51 }
 0xd03   :  { %4103 = vmatpush3.msra.mxu0 %v2214_v51 }
 0xd04   :  { %4118 = vmatprep.subr.mxu0 %v2443_v44 }
 0xd05   :  { %1712 = vadd.xlane.f32.xlu0 %v1711_v38 }
 0xd84   :  { %v2047_v42 = vpop.xlane.xlu1 %2046 }
 0xd85   :  { %4270 = vrcp.f32 %v2047_v42 }
 0xd86   :  { %v2044_v49 = vpop.xlane.xlu0 %2043 }
 0xd87   :  { %4272 = vrcp.f32 %v2044_v49 }
 0xd8a   :  { %v1710_v43 = vpop.xlane.xlu0 %1709 }
 0xd8b   :  { %4274 = vrcp.f32 %v1710_v43 }
 0xd8e   :  { %v1713_v5 = vpop.xlane.xlu0 %1712 }
 0xd8f   :  { %4276 = vrcp.f32 %v1713_v5 }
 0xd92   :  { %v4271_v52 = vpop.eup %4270 }
 0xd94   :  { %v4273_v55 = vpop.eup %4272 }
 0xd98   :  { %v4275_v6 = vpop.eup %4274 }
 0xd99   :  { %v1868_v9 = vmul.f32 %v4275_v6, %v4662_v12 }
 0xd9c   :  { %v4277_v7 = vpop.eup %4276 }
 0xd9d   :  { %v1869_v10 = vmul.f32 %v4277_v7, %v4660_v11 }
 0xdba   :  { %v2198_v53 = vpop.f32.mrf.mxu1 }
 0xdbb   :  { %v2203_v54 = vmul.f32 %v4271_v52, %v2198_v53 }
 0xdbc   :  { %v2122_v56 = vpop.f32.mrf.mxu0  ;;  %v4095_v57 = vpop.f32.mrf.mxu1 }
 0xdbd   :  { %v2202_v58 = vmul.f32 %v4273_v55, %v2122_v56  ;;  %2208 = vrot.lane.b32.xlu1 %v2203_v54, %s4368_s28 }
 0xdbe   :  { %v4090_v59 = vpop.f32.mrf.mxu0 }
 0xdbf   :  { %2206 = vrot.lane.b32.xlu0 %v2202_v58, %s4368_s28 }
 0xdde   :  { %1298 = vadd.xlane.f32.xlu0 %v1297_v1  ;;  %v3770_v1 = vld [vmem:[%s4873_s7 + $0x11] ss:$0 sm:$0xff] }
 0xde1   :  { %1295 = vadd.xlane.f32.xlu1 %v1294_v3 }
 0xde2   :  { %1305 = vadd.xlane.f32.xlu0 %v1304_v39 }
 0xde5   :  { %1308 = vadd.xlane.f32.xlu1 %v1307_v45 }
 0xe2f   :  { %v2209_v8 = vpop.permute.xlu1 %2208 }
 0xe30   :  { %v2213_v15 = vsel %vm56_vm0, %v1869_v10, %v2209_v8 }
 0xe31   :  { %v2207_v13 = vpop.permute.xlu0 %2206 }
 0xe32   :  { %v2212_v14 = vsel %vm56_vm0, %v1868_v9, %v2207_v13 }
 0xe33   :  { %4104 = vmatprep.mubr.msk.f32.mxu0 %vm198_vm1, %v2212_v14 }
 0xe34   :  { %4105 = vmatmul.mubr.msk.f32.vlgmr.msra.gmra.mxu0 %vm198_vm1, %v2213_v15 }
 0xe35   :  { %4119 = vmatpush3.msra.mxu0 %v2443_v44 }
 0xe36   :  { %4120 = vmatprep.subr.mxu0 %v2442_v16 }
 0xe37   :  { %4121 = vmatpush3.msra.mxu0 %v2442_v16 }
 0xe38   :  { %4122 = vmatprep.subr.mxu0 %v2441_v46 }
 0xe39   :  { %4123 = vmatpush3.msra.mxu0 %v2441_v46 }
 0xe3a   :  { %4124 = vmatprep.subr.mxu0 %v2440_v18 }
 0xe3b   :  { %4125 = vmatpush3.msra.mxu0 %v2440_v18 }
 0xe3c   :  { %4139 = vmatprep.subr.mxu0 %v4361_v48 }
 0xe67   :  { %v1299_v11 = vpop.xlane.xlu0 %1298 }
 0xe68   :  { %v1301_v19 = vmul.f32 0.03125, %v1299_v11 }
 0xe6a   :  { %v1296_v12 = vpop.xlane.xlu1 %1295  ;;  %v1313_v25 = vmul.f32 %v1301_v19, %v1301_v19  ;;  %v1317_v30 = vsub.f32 %v4684_v63, %v1301_v19  ;;  %v2353_v63 = vld [vmem:[#allocation2 + $0x118] sm:$0xff] }
 0xe6b   :  { %v1300_v20 = vmul.f32 0.03125, %v1296_v12  ;;  %v1306_v21 = vpop.xlane.xlu0 %1305  ;;  %4107 = vmatprep.subr.mxu1 %v2353_v63 }
 0xe6c   :  { %v1310_v22 = vmul.f32 0.03125, %v1306_v21  ;;  %4108 = vmatpush3.msra.mxu1 %v2353_v63 }
 0xe6d   :  { %v1312_v23 = vmul.f32 %v1300_v20, %v1300_v20  ;;  %v1316_v33 = vsub.f32 %v1292_v0, %v1300_v20  ;;  %v2352_v0 = vld [vmem:[#allocation2 + $0x110] sm:$0xff]  ;;  %v3765_v20 = vld [vmem:[%s4873_s7 + $0xe] ss:$0 sm:$0xff] }
 0xe6e   :  { %v1309_v24 = vpop.xlane.xlu1 %1308  ;;  %4109 = vmatprep.subr.mxu1 %v2352_v0 }
 0xe6f   :  { %v1314_v26 = vsub.f32 %v1310_v22, %v1312_v23  ;;  %v1311_v27 = vmul.f32 0.03125, %v1309_v24  ;;  %4110 = vmatpush3.msra.mxu1 %v2352_v0 }
 0xe71   :  { %v1318_v28 = vadd.f32 1e-12, %v1314_v26  ;;  %v1315_v29 = vsub.f32 %v1311_v27, %v1313_v25  ;;  %v3766_v25 = vld [vmem:[%s4873_s7 + $0xf] ss:$0 sm:$0xff] }
 0xe73   :  { %4278 = vrsqrt.f32 %v1318_v28  ;;  %v1319_v31 = vadd.f32 1e-12, %v1315_v29  ;;  %v3767_v29 = vld [vmem:[%s4873_s7 + $0x10] ss:$0 sm:$0xff] }
 0xe75   :  { %4280 = vrsqrt.f32 %v1319_v31 }
 0xe80   :  { %v4279_v34 = vpop.eup %4278 }
 0xe81   :  { %v1322_v36 = vmul.f32 %v4279_v34, %v1316_v33 }
 0xe82   :  { %v4281_v32 = vpop.eup %4280 }
 0xe83   :  { %v1323_v38 = vmul.f32 %v4281_v32, %v1317_v30  ;;  %v1329_v40 = vmul.f32 %v3740_v35, %v1322_v36  ;;  %v3777_v36 = vld [vmem:[%s4870_s4] ss:$0 sm:$0xff] }
 0xe85   :  { %v1330_v41 = vmul.f32 %v3740_v35, %v1323_v38  ;;  %v1336_v42 = vadd.f32 %v3741_v37, %v1329_v40 }
 0xe87   :  { %v1337_v49 = vadd.f32 %v3741_v37, %v1330_v41  ;;  %4126 = vmatprep.mubr.msk.f32.mxu0 %vm198_vm1, %v1336_v42  ;;  %v3778_v41 = vld [vmem:[%s4870_s4 + $0x1] ss:$0 sm:$0xff] }
 0xe89   :  { %4127 = vmatmul.mubr.msk.f32.vlgmr.msra.gmra.mxu0 %vm198_vm1, %v1337_v49 }
 0xe8a   :  { %4141 = vmatprep.mubr.msk.f32.mxu0 %vm4362_vm2, %v4361_v48 }
 0xef4   :  { %v4106_v51 = vpop.f32.mrf.mxu0 }
 0xef5   :  { %v2301_v52 = vadd.f32 %v4106_v51, %v3762_v50 }
 0xef6   :  { %v2295_v53 = vpop.f32.mrf.mxu0 }
 0xef7   :  { %v2305_v54 = vadd.f32 %v2301_v52, %v4583_v47  ;;  %v2296_v55 = vadd.f32 %v3762_v50, %v2295_v53  ;;  %v2351_v47 = vld [vmem:[#allocation2 + $0x108] sm:$0xff] }
 0xef8   :  { %4111 = vmatprep.subr.mxu1 %v2351_v47 }
 0xef9   :  { %v2304_v56 = vadd.f32 %v2296_v55, %v4581_v17  ;;  %v2309_v57 = vsel %vm198_vm1, %v2305_v54, 0.0  ;;  %v2315_v58 = vmul.f32 %v2305_v54, %v2305_v54  ;;  %v2350_v17 = vld [vmem:[#allocation2 + $0x100] sm:$0xff]  ;;  %4112 = vmatpush3.msra.mxu1 %v2351_v47 }
 0xefa   :  { %2310 = vadd.xlane.f32.xlu1 %v2309_v57  ;;  %4113 = vmatprep.subr.mxu1 %v2350_v17 }
 0xefb   :  { %v2306_v59 = vsel %vm198_vm1, %v2304_v56, 0.0  ;;  %v2314_v60 = vmul.f32 %v2304_v56, %v2304_v56  ;;  %v2319_v61 = vsel %vm198_vm1, %v2315_v58, 0.0  ;;  %4114 = vmatpush3.msra.mxu1 %v2350_v17 }
 0xefc   :  { %2307 = vadd.xlane.f32.xlu0 %v2306_v59  ;;  %4129 = vmatprep.subr.mxu1 %v4361_v48 }
 0xefd   :  { %v2316_v62 = vsel %vm198_vm1, %v2314_v60, 0.0 }
 0xefe   :  { %2320 = vadd.xlane.f32.xlu1 %v2319_v61 }
 0xf00   :  { %2317 = vadd.xlane.f32.xlu0 %v2316_v62 }
 0xf49   :  { %v4128_v2 = vpop.f32.mrf.mxu0 }
 0xf4a   :  { %v4725_v3 = vadd.f32 %v4128_v2, %v3770_v1 }
 0xf4b   :  { %v2521_v4 = vpop.f32.mrf.mxu0 }
 0xf4c   :  { %2794 = vrot.lane.b32.xlu1 %v4725_v3, %s4363_s23  ;;  %v4729_v39 = vadd.f32 %v3770_v1, %v2521_v4 }
 0xf50   :  { %2874 = vrot.lane.b32.xlu1 %v4729_v39, %s4366_s26 }
 0xf54   :  { %2952 = vrot.lane.b32.xlu1 %v4725_v3, %s4366_s26 }
 0xf83   :  { %v2311_v45 = vpop.xlane.xlu1 %2310 }
 0xf84   :  { %v2313_v44 = vmul.f32 0.03125, %v2311_v45 }
 0xf85   :  { %v2308_v43 = vpop.xlane.xlu0 %2307 }
 0xf86   :  { %v2312_v5 = vmul.f32 0.03125, %v2308_v43  ;;  %v2325_v7 = vmul.f32 %v2313_v44, %v2313_v44  ;;  %v2329_v18 = vsub.f32 %v2305_v54, %v2313_v44 }
 0xf87   :  { %v2321_v6 = vpop.xlane.xlu1 %2320 }
 0xf88   :  { %v2323_v8 = vmul.f32 0.03125, %v2321_v6  ;;  %v2324_v10 = vmul.f32 %v2312_v5, %v2312_v5  ;;  %v2328_v12 = vsub.f32 %v2304_v56, %v2312_v5 }
 0xf89   :  { %v2318_v9 = vpop.xlane.xlu0 %2317 }
 0xf8a   :  { %v2327_v13 = vsub.f32 %v2323_v8, %v2325_v7  ;;  %v2322_v14 = vmul.f32 0.03125, %v2318_v9 }
 0xf8c   :  { %v2331_v15 = vadd.f32 1e-12, %v2327_v13  ;;  %v2326_v16 = vsub.f32 %v2322_v14, %v2324_v10 }
 0xf8e   :  { %4282 = vrsqrt.f32 %v2331_v15  ;;  %v2330_v46 = vadd.f32 1e-12, %v2326_v16 }
 0xf90   :  { %4284 = vrsqrt.f32 %v2330_v46 }
 0xf9b   :  { %v4283_v11 = vpop.eup %4282 }
 0xf9c   :  { %v2335_v19 = vmul.f32 %v4283_v11, %v2329_v18 }
 0xf9d   :  { %v4285_v21 = vpop.eup %4284 }
 0xf9e   :  { %v2334_v22 = vmul.f32 %v4285_v21, %v2328_v12  ;;  %v2342_v23 = vmul.f32 %v3765_v20, %v2335_v19 }
 0xfa0   :  { %v2341_v24 = vmul.f32 %v3765_v20, %v2334_v22  ;;  %v4743_v27 = vadd.f32 %v3766_v25, %v2342_v23  ;;  %v3219_v23 = vld [vmem:[#allocation2 + $0x158] sm:$0xff] }
 0xfa2   :  { %v4741_v26 = vadd.f32 %v3766_v25, %v2341_v24  ;;  %v3218_v24 = vld [vmem:[#allocation2 + $0x150] sm:$0xff] }
 0xfa4   :  { %4115 = vmatprep.mubr.msk.f32.mxu1 %vm198_vm1, %v4741_v26 }
 0xfa5   :  { %4116 = vmatmul.mubr.msk.f32.vlgmr.msra.gmra.mxu1 %vm198_vm1, %v4743_v27 }
 0xfa6   :  { %4130 = vmatpush3.xpose.msk.msra.mxu1 %vm56_vm0, %v4729_v39  ;;  %4131 = vmatprep.mubr.msk.f32.mxu1 %vm4362_vm2, %v4361_v48 }
 0xfa7   :  { %4134 = vmatprep.subr.mxu1 %v4361_v48 }
 0xfbe   :  { %v2795_v35 = vpop.permute.xlu1 %2794 }
 0xfc2   :  { %v2875_v53 = vpop.permute.xlu1 %2874 }
 0xfc6   :  { %v2953_v54 = vpop.permute.xlu1 %2952 }
0x1065   :  { %v4117_v28 = vpop.f32.mrf.mxu1 }
0x1066   :  { %v2437_v34 = vadd.f32 %v4117_v28, %v3767_v29 }
0x1067   :  { %v2431_v31 = vpop.f32.mrf.mxu1 }
0x1068   :  { %v2432_v33 = vadd.f32 %v3767_v29, %v2431_v31  ;;  %v3217_v29 = vld [vmem:[#allocation2 + $0x148] sm:$0xff]  ;;  %v3216_v31 = vld [vmem:[#allocation2 + $0x140] sm:$0xff] }
0x106a   :  { %4132 = vmatmul.mubr.msk.f32.vlgmr.msra.gmra.mxu1 %vm56_vm0, %v2432_v33 }
0x106b   :  { %4135 = vmatpush3.xpose.msk.msra.mxu1 %vm56_vm0, %v4725_v3  ;;  %4136 = vmatprep.mubr.msk.f32.mxu1 %vm4362_vm2, %v4361_v48 }
0x106c   :  { %4144 = vmatprep.subr.mxu1 %v4361_v48 }
0x106e   :  { %4137 = vmatmul.mubr.msk.f32.vlgmr.msra.gmra.mxu1 %vm56_vm0, %v2437_v34 }
0x106f   :  { %4145 = vmatpush3.msra.mxu1 %v2795_v35  ;;  %4146 = vmatprep.mubr.msk.f32.mxu1 %vm4362_vm2, %v4361_v48 }
0x1070   :  { %4154 = vmatprep.subr.mxu1 %v4361_v48 }
0x112a   :  { %v2602_v30 = vpop.f32.mrf.mxu1 }
0x112b   :  { %v2682_v32 = vmul.f32 0.25, %v2602_v30 }
0x112c   :  { %v4133_v37 = vpop.f32.mrf.mxu1 }
0x112d   :  { %v2696_v38 = vadd.f32 %v3777_v36, %v2682_v32 }
0x112e   :  { %v2678_v40 = vpop.f32.mrf.mxu1 }
0x112f   :  { %v2683_v42 = vmul.f32 0.25, %v2678_v40  ;;  %v2698_v49 = vsel %vm436_vm3, %v2696_v38, -inf }
0x1130   :  { %2699 = vmax.xlane.f32.xlu0 %v2698_v49  ;;  %v4138_v50 = vpop.f32.mrf.mxu1 }
0x1131   :  { %v2697_v51 = vadd.f32 %v3778_v41, %v2683_v42 }
0x1133   :  { %v2701_v52 = vsel %vm436_vm3, %v2697_v51, -inf }
0x1134   :  { %2702 = vmax.xlane.f32.xlu1 %v2701_v52 }
0x1145   :  { %2950 = vrot.lane.b32.xlu1 %v2437_v34, %s4366_s26 }
0x1146   :  { %2718 = vrot.lane.b32.xlu0 %v4729_v39, %s4363_s23 }
0x114a   :  { %2872 = vrot.lane.b32.xlu0 %v2432_v33, %s4366_s26 }
0x11b9   :  { %v2700_v55 = vpop.xlane.xlu0 %2699 }
0x11ba   :  { %v2704_v56 = vsub.f32 %v2696_v38, %v2700_v55 }
0x11bc   :  { %v2706_v57 = vmul.f32 1.442695, %v2704_v56  ;;  %v3787_v56 = vld [vmem:[%s4873_s7 + $0x12] ss:$0 sm:$0xff] }
0x11bd   :  { %v2719_v58 = vpop.permute.xlu0 %2718  ;;  %v2703_v59 = vpop.xlane.xlu1 %2702 }
0x11be   :  { %4286 = vpow2.f32 %v2706_v57  ;;  %v2705_v60 = vsub.f32 %v2697_v51, %v2703_v59  ;;  %4140 = vmatpush3.msra.mxu0 %v2719_v58 }
0x11bf   :  { %4149 = vmatprep.subr.mxu0 %v4361_v48 }
0x11c0   :  { %v2708_v61 = vmul.f32 1.442695, %v2705_v60 }
0x11c1   :  { %v2873_v0 = vpop.permute.xlu0 %2872  ;;  %v2951_v47 = vpop.permute.xlu1 %2950 }
0x11c2   :  { %4288 = vpow2.f32 %v2708_v61 }
0x11cb   :  { %v4287_v62 = vpop.eup %4286 }
0x11cc   :  { %4142 = vmatmul.mubr.msk.f32.vlgmr.msra.gmra.mxu0 %vm436_vm3, %v4287_v62 }
0x11cd   :  { %4150 = vmatpush3.xpose.msk.msra.mxu0 %vm56_vm0, %v2875_v53  ;;  %4151 = vmatprep.mubr.msk.f32.mxu0 %vm4362_vm2, %v4361_v48 }
0x11ce   :  { %4159 = vmatprep.subr.mxu0 %v4361_v48 }
0x11cf   :  { %v4289_v63 = vpop.eup %4288 }
0x11d0   :  { %4147 = vmatmul.mubr.msk.f32.vlgmr.msra.gmra.mxu1 %vm436_vm3, %v4289_v63  ;;  %4152 = vmatmul.mubr.msk.f32.vlgmr.msra.gmra.mxu0 %vm56_vm0, %v2873_v0  ;;  %v2713_v22 = vsel %vm436_vm3, %v4289_v63, 0.0 }
0x11d1   :  { %4155 = vmatpush3.xpose.msk.msra.mxu1 %vm56_vm0, %v2953_v54  ;;  %4156 = vmatprep.mubr.msk.f32.mxu1 %vm4362_vm2, %v4361_v48 }
0x11d2   :  { %4164 = vmatprep.subr.mxu1 %v4361_v48  ;;  %4161 = vmatprep.mubr.msk.f32.mxu0 %vm4362_vm2, %v4361_v48 }
0x11d4   :  { %4157 = vmatmul.mubr.msk.f32.vlgmr.msra.gmra.mxu1 %vm56_vm0, %v2951_v47 }
0x11d5   :  { %4166 = vmatprep.mubr.msk.f32.mxu1 %vm4362_vm2, %v4361_v48 }
0x128c   :  { %v4796_v17 = vpop.f32.mrf.mxu0 }
0x128e   :  { %v4143_v1 = vpop.f32.mrf.mxu0 }
0x1290   :  { %v4798_v2 = vpop.f32.mrf.mxu1  ;;  %v2946_v4 = vpop.f32.mrf.mxu0 }
0x1291   :  { %v3028_v45 = vmul.f32 0.25, %v2946_v4  ;;  %v3355_v4 = vld [vmem:[#allocation2 + $0x178] sm:$0xff] }
0x1292   :  { %v4148_v44 = vpop.f32.mrf.mxu1  ;;  %v4153_v43 = vpop.f32.mrf.mxu0 }
0x1293   :  { %v3030_v5 = vadd.f32 %v3777_v36, %v3028_v45  ;;  %v3354_v45 = vld [vmem:[#allocation2 + $0x170] sm:$0xff] }
0x1294   :  { %v3024_v6 = vpop.f32.mrf.mxu1 }
0x1295   :  { %v3029_v7 = vmul.f32 0.25, %v3024_v6  ;;  %v3032_v8 = vsel %vm436_vm3, %v3030_v5, -inf }
0x1296   :  { %3033 = vmax.xlane.f32.xlu0 %v3032_v8  ;;  %v4158_v9 = vpop.f32.mrf.mxu1 }
0x1297   :  { %v3031_v10 = vadd.f32 %v3778_v41, %v3029_v7 }
0x1299   :  { %v3035_v13 = vsel %vm436_vm3, %v3031_v10, -inf }
0x129a   :  { %3036 = vmax.xlane.f32.xlu1 %v3035_v13 }
0x12ab   :  { %3128 = vrot.lane.b32.xlu1 %v4725_v3, %s4365_s25 }
0x12ac   :  { %3052 = vrot.lane.b32.xlu0 %v4729_v39, %s4365_s25  ;;  %v2710_v39 = vsel %vm436_vm3, %v4287_v62, 0.0 }
0x131f   :  { %v3034_v48 = vpop.xlane.xlu0 %3033 }
0x1320   :  { %v3038_v14 = vsub.f32 %v3030_v5, %v3034_v48 }
0x1322   :  { %v3040_v15 = vmul.f32 1.442695, %v3038_v14 }
0x1323   :  { %v3053_v16 = vpop.permute.xlu0 %3052  ;;  %v3037_v46 = vpop.xlane.xlu1 %3036 }
0x1324   :  { %4290 = vpow2.f32 %v3040_v15  ;;  %v3039_v18 = vsub.f32 %v3031_v10, %v3037_v46  ;;  %4160 = vmatpush3.msra.mxu0 %v3053_v16 }
0x1325   :  { %4169 = vmatprep.subr.mxu0 %v3219_v23 }
0x1326   :  { %v3042_v11 = vmul.f32 1.442695, %v3039_v18 }
0x1327   :  { %v3129_v12 = vpop.permute.xlu1 %3128 }
0x1328   :  { %4292 = vpow2.f32 %v3042_v11  ;;  %4165 = vmatpush3.msra.mxu1 %v3129_v12  ;;  %v3790_v12 = vld [vmem:[%s4873_s7 + $0x13] ss:$0 sm:$0xff] }
0x1329   :  { %4180 = vmatprep.subr.mxu1 %v3355_v4 }
0x1331   :  { %v4291_v19 = vpop.eup %4290 }
0x1332   :  { %4162 = vmatmul.mubr.msk.f32.vlgmr.msra.gmra.mxu0 %vm436_vm3, %v4291_v19  ;;  %v3044_v3 = vsel %vm436_vm3, %v4291_v19, 0.0 }
0x1333   :  { %3045 = vadd.xlane.f32.xlu0 %v3044_v3  ;;  %4170 = vmatpush3.msra.mxu0 %v3219_v23 }
0x1334   :  { %4171 = vmatprep.subr.mxu0 %v3218_v24 }
0x1335   :  { %v4293_v20 = vpop.eup %4292  ;;  %4172 = vmatpush3.msra.mxu0 %v3218_v24 }
0x1336   :  { %4167 = vmatmul.mubr.msk.f32.vlgmr.msra.gmra.mxu1 %vm436_vm3, %v4293_v20  ;;  %v3047_v21 = vsel %vm436_vm3, %v4293_v20, 0.0  ;;  %4173 = vmatprep.subr.mxu0 %v3217_v29 }
0x1337   :  { %2711 = vadd.xlane.f32.xlu0 %v2710_v39  ;;  %3048 = vadd.xlane.f32.xlu1 %v3047_v21  ;;  %v3791_v39 = vld [vmem:[%s4873_s7 + $0x14] ss:$0 sm:$0xff] }
0x1338   :  { %4174 = vmatpush3.msra.mxu0 %v3217_v29  ;;  %4181 = vmatpush3.msra.mxu1 %v3355_v4  ;;  %v3466_v29 = vld [vmem:[#allocation2 + $0x1b0] sm:$0xff] }
0x1339   :  { %4175 = vmatprep.subr.mxu0 %v3216_v31  ;;  %4182 = vmatprep.subr.mxu1 %v3354_v45 }
0x133a   :  { %4176 = vmatpush3.msra.mxu0 %v3216_v31  ;;  %4183 = vmatpush3.msra.mxu1 %v3354_v45  ;;  %v3465_v31 = vld [vmem:[#allocation2 + $0x1a8] sm:$0xff] }
0x133b   :  { %2714 = vadd.xlane.f32.xlu0 %v2713_v22 }
0x13bc   :  { %v3046_v25 = vpop.xlane.xlu0 %3045 }
0x13bd   :  { %4294 = vrcp.f32 %v3046_v25 }
0x13c0   :  { %v3049_v28 = vpop.xlane.xlu1 %3048  ;;  %v2712_v40 = vpop.xlane.xlu0 %2711 }
0x13c1   :  { %4296 = vrcp.f32 %v3049_v28  ;;  %v3467_v28 = vld [vmem:[#allocation2 + $0x1b8] sm:$0xff] }
0x13c2   :  { %4298 = vrcp.f32 %v2712_v40  ;;  %4191 = vmatprep.subr.mxu0 %v3467_v28 }
0x13c4   :  { %v2715_v41 = vpop.xlane.xlu0 %2714 }
0x13c5   :  { %4300 = vrcp.f32 %v2715_v41 }
0x13ca   :  { %v4295_v33 = vpop.eup %4294 }
0x13ce   :  { %v4297_v36 = vpop.eup %4296 }
0x13cf   :  { %v4299_v42 = vpop.eup %4298 }
0x13d0   :  { %v2870_v49 = vmul.f32 %v4299_v42, %v4796_v17 }
0x13d2   :  { %v4301_v50 = vpop.eup %4300 }
0x13d3   :  { %v2871_v53 = vmul.f32 %v4301_v50, %v4798_v2 }
0x13f2   :  { %v3124_v34 = vpop.f32.mrf.mxu0 }
0x13f3   :  { %v3204_v35 = vmul.f32 %v4295_v33, %v3124_v34  ;;  %v3464_v33 = vld [vmem:[#allocation2 + $0x1a0] sm:$0xff]  ;;  %v3463_v34 = vld [vmem:[#allocation2 + $0x198] sm:$0xff] }
0x13f4   :  { %v4163_v30 = vpop.f32.mrf.mxu0 }
0x13f5   :  { %3208 = vrot.lane.b32.xlu0 %v3204_v35, %s4368_s28  ;;  %v3462_v35 = vld [vmem:[#allocation2 + $0x190] sm:$0xff]  ;;  %v3461_v30 = vld [vmem:[#allocation2 + $0x188] sm:$0xff] }
0x13f6   :  { %v3200_v32 = vpop.f32.mrf.mxu1 }
0x13f7   :  { %v3205_v37 = vmul.f32 %v4297_v36, %v3200_v32  ;;  %v3460_v36 = vld [vmem:[#allocation2 + $0x180] sm:$0xff]  ;;  %v3792_v32 = vld [vmem:[%s4873_s7 + $0x15] ss:$0 sm:$0xff] }
0x13f8   :  { %v4168_v38 = vpop.f32.mrf.mxu1 }
0x13f9   :  { %3210 = vrot.lane.b32.xlu1 %v3205_v37, %s4368_s28 }
0x1467   :  { %v3209_v51 = vpop.permute.xlu0 %3208 }
0x1468   :  { %v3214_v52 = vsel %vm56_vm0, %v2870_v49, %v3209_v51 }
0x1469   :  { %4177 = vmatprep.mubr.msk.f32.mxu0 %vm198_vm1, %v3214_v52 }
0x146b   :  { %v3211_v54 = vpop.permute.xlu1 %3210 }
0x146c   :  { %v3215_v55 = vsel %vm56_vm0, %v2871_v53, %v3211_v54 }
0x146d   :  { %4178 = vmatmul.mubr.msk.f32.vlgmr.msra.gmra.mxu0 %vm198_vm1, %v3215_v55 }
0x146e   :  { %4192 = vmatpush3.msra.mxu0 %v3467_v28 }
0x146f   :  { %4193 = vmatprep.subr.mxu0 %v3466_v29 }
0x1470   :  { %4194 = vmatpush3.msra.mxu0 %v3466_v29 }
0x1471   :  { %4195 = vmatprep.subr.mxu0 %v3465_v31 }
0x1472   :  { %4196 = vmatpush3.msra.mxu0 %v3465_v31  ;;  %v3798_v31 = vld [vmem:[%s4873_s7 + $0x17] ss:$0 sm:$0xff] }
0x1473   :  { %4197 = vmatprep.subr.mxu0 %v3464_v33 }
0x1474   :  { %4198 = vmatpush3.msra.mxu0 %v3464_v33 }
0x1475   :  { %4199 = vmatprep.subr.mxu0 %v3463_v34 }
0x1476   :  { %4200 = vmatpush3.msra.mxu0 %v3463_v34 }
0x1477   :  { %4201 = vmatprep.subr.mxu0 %v3462_v35 }
0x1478   :  { %4202 = vmatpush3.msra.mxu0 %v3462_v35 }
0x1479   :  { %4203 = vmatprep.subr.mxu0 %v3461_v30 }
0x147a   :  { %4204 = vmatpush3.msra.mxu0 %v3461_v30 }
0x147b   :  { %4205 = vmatprep.subr.mxu0 %v3460_v36 }
0x147c   :  { %4206 = vmatpush3.msra.mxu0 %v3460_v36  ;;  %v3799_v36 = vld [vmem:[%s4873_s7 + $0x18] ss:$0 sm:$0xff] }
0x152d   :  { %v4179_v57 = vpop.f32.mrf.mxu0 }
0x152e   :  { %v3303_v58 = vadd.f32 %v4179_v57, %v3787_v56 }
0x152f   :  { %v3297_v59 = vpop.f32.mrf.mxu0 }
0x1530   :  { %v3307_v60 = vadd.f32 %v3303_v58, %v4743_v27  ;;  %v3298_v61 = vadd.f32 %v3787_v56, %v3297_v59  ;;  %v3353_v27 = vld [vmem:[#allocation2 + $0x168] sm:$0xff] }
0x1531   :  { %4184 = vmatprep.subr.mxu1 %v3353_v27 }
0x1532   :  { %v3306_v62 = vadd.f32 %v3298_v61, %v4741_v26  ;;  %v3311_v63 = vsel %vm198_vm1, %v3307_v60, 0.0  ;;  %v3317_v17 = vmul.f32 %v3307_v60, %v3307_v60  ;;  %v3352_v26 = vld [vmem:[#allocation2 + $0x160] sm:$0xff]  ;;  %4185 = vmatpush3.msra.mxu1 %v3353_v27 }
0x1533   :  { %3312 = vadd.xlane.f32.xlu0 %v3311_v63  ;;  %4186 = vmatprep.subr.mxu1 %v3352_v26 }
0x1534   :  { %v3308_v0 = vsel %vm198_vm1, %v3306_v62, 0.0  ;;  %v3316_v47 = vmul.f32 %v3306_v62, %v3306_v62  ;;  %v3321_v2 = vsel %vm198_vm1, %v3317_v17, 0.0  ;;  %4187 = vmatpush3.msra.mxu1 %v3352_v26  ;;  %v3795_v17 = vld [vmem:[%s4873_s7 + $0x16] ss:$0 sm:$0xff] }
0x1535   :  { %3309 = vadd.xlane.f32.xlu1 %v3308_v0 }
0x1536   :  { %v3318_v1 = vsel %vm198_vm1, %v3316_v47, 0.0 }
0x1537   :  { %3319 = vadd.xlane.f32.xlu0 %v3318_v1 }
0x1539   :  { %3322 = vadd.xlane.f32.xlu1 %v3321_v2 }
0x15bc   :  { %v3313_v44 = vpop.xlane.xlu0 %3312 }
0x15bd   :  { %v3315_v5 = vmul.f32 0.03125, %v3313_v44 }
0x15be   :  { %v3310_v43 = vpop.xlane.xlu1 %3309 }
0x15bf   :  { %v3314_v6 = vmul.f32 0.03125, %v3310_v43  ;;  %v3327_v13 = vmul.f32 %v3315_v5, %v3315_v5  ;;  %v3331_v19 = vsub.f32 %v3307_v60, %v3315_v5 }
0x15c0   :  { %v3320_v7 = vpop.xlane.xlu0 %3319 }
0x15c1   :  { %v3326_v8 = vmul.f32 %v3314_v6, %v3314_v6  ;;  %v3324_v9 = vmul.f32 0.03125, %v3320_v7  ;;  %v3330_v18 = vsub.f32 %v3306_v62, %v3314_v6 }
0x15c2   :  { %v3323_v10 = vpop.xlane.xlu1 %3322 }
0x15c3   :  { %v3328_v48 = vsub.f32 %v3324_v9, %v3326_v8  ;;  %v3325_v14 = vmul.f32 0.03125, %v3323_v10  ;;  %v3603_v9 = vld [vmem:[#allocation2 + $0x1d8] sm:$0xff]  ;;  %v3602_v10 = vld [vmem:[#allocation2 + $0x1d0] sm:$0xff] }
0x15c4   :  { %4210 = vmatprep.subr.mxu1 %v3603_v9 }
0x15c5   :  { %v3332_v15 = vadd.f32 1e-12, %v3328_v48  ;;  %v3329_v16 = vsub.f32 %v3325_v14, %v3327_v13  ;;  %v3601_v13 = vld [vmem:[#allocation2 + $0x1c8] sm:$0xff]  ;;  %v3600_v48 = vld [vmem:[#allocation2 + $0x1c0] sm:$0xff] }
0x15c7   :  { %4302 = vrsqrt.f32 %v3332_v15  ;;  %v3333_v46 = vadd.f32 1e-12, %v3329_v16 }
0x15c9   :  { %4304 = vrsqrt.f32 %v3333_v46 }
0x15d4   :  { %v4303_v11 = vpop.eup %4302 }
0x15d5   :  { %v3336_v3 = vmul.f32 %v4303_v11, %v3330_v18 }
0x15d6   :  { %v4305_v20 = vpop.eup %4304 }
0x15d7   :  { %v3337_v21 = vmul.f32 %v4305_v20, %v3331_v19  ;;  %v3343_v22 = vmul.f32 %v3790_v12, %v3336_v3 }
0x15d9   :  { %v3344_v23 = vmul.f32 %v3790_v12, %v3337_v21  ;;  %v3350_v24 = vadd.f32 %v3791_v39, %v3343_v22 }
0x15db   :  { %v3351_v25 = vadd.f32 %v3791_v39, %v3344_v23  ;;  %4188 = vmatprep.mubr.msk.f32.mxu1 %vm198_vm1, %v3350_v24 }
0x15dd   :  { %4189 = vmatmul.mubr.msk.f32.vlgmr.msra.gmra.mxu1 %vm198_vm1, %v3351_v25 }
0x15de   :  { %4211 = vmatpush3.msra.mxu1 %v3603_v9 }
0x15df   :  { %4212 = vmatprep.subr.mxu1 %v3602_v10 }
0x15e0   :  { %4213 = vmatpush3.msra.mxu1 %v3602_v10 }
0x15e1   :  { %4214 = vmatprep.subr.mxu1 %v3601_v13 }
0x15e2   :  { %4215 = vmatpush3.msra.mxu1 %v3601_v13 }
0x15e3   :  { %4216 = vmatprep.subr.mxu1 %v3600_v48 }
0x15e4   :  { %4217 = vmatpush3.msra.mxu1 %v3600_v48 }
0x169d   :  { %v4190_v37 = vpop.f32.mrf.mxu1 }
0x169e   :  { %v3439_v38 = vadd.f32 %v4190_v37, %v3792_v32 }
0x169f   :  { %v3433_v40 = vpop.f32.mrf.mxu1 }
0x16a0   :  { %v3443_v41 = vmul.f32 %v3439_v38, %v3439_v38  ;;  %v3434_v42 = vadd.f32 %v3792_v32, %v3433_v40 }
0x16a2   :  { %v3445_v49 = vmul.f32 %v3443_v41, %v3439_v38  ;;  %v3442_v50 = vmul.f32 %v3434_v42, %v3434_v42 }
0x16a4   :  { %v3447_v51 = vmul.f32 0.044715, %v3445_v49  ;;  %v3444_v52 = vmul.f32 %v3442_v50, %v3434_v42 }
0x16a6   :  { %v3449_v53 = vadd.f32 %v3447_v51, %v3439_v38  ;;  %v3446_v54 = vmul.f32 0.044715, %v3444_v52 }
0x16a8   :  { %v3451_v55 = vmul.f32 0.7978846, %v3449_v53  ;;  %v3448_v56 = vadd.f32 %v3446_v54, %v3434_v42 }
0x16aa   :  { %4306 = vtanh.f32 %v3451_v55  ;;  %v3450_v57 = vmul.f32 0.7978846, %v3448_v56 }
0x16ac   :  { %4308 = vtanh.f32 %v3450_v57 }
0x16b7   :  { %v4307_v58 = vpop.eup %4306 }
0x16b8   :  { %v3455_v59 = vadd.f32 1.0, %v4307_v58 }
0x16b9   :  { %v4309_v60 = vpop.eup %4308 }
0x16ba   :  { %v3454_v61 = vadd.f32 1.0, %v4309_v60  ;;  %v3457_v62 = vmul.f32 0.5, %v3455_v59 }
0x16bc   :  { %v3456_v63 = vmul.f32 0.5, %v3454_v61  ;;  %v3459_v47 = vmul.f32 %v3457_v62, %v3439_v38  ;;  %v3800_v38 = vld [vmem:[%s4873_s7 + $0x19] ss:$0 sm:$0xff] }
0x16be   :  { %v3458_v0 = vmul.f32 %v3456_v63, %v3434_v42 }
0x16c0   :  { %4207 = vmatprep.mubr.msk.f32.mxu0 %vm1210_vm4, %v3458_v0 }
0x16c1   :  { %4208 = vmatmul.mubr.msk.f32.vlgmr.msra.gmra.mxu0 %vm1210_vm4, %v3459_v47 }
0x1781   :  { %v4209_v1 = vpop.f32.mrf.mxu0 }
0x1782   :  { %v3551_v2 = vadd.f32 %v4209_v1, %v3795_v17 }
0x1783   :  { %v3545_v4 = vpop.f32.mrf.mxu0 }
0x1784   :  { %v3555_v45 = vadd.f32 %v3551_v2, %v3351_v25  ;;  %v3546_v27 = vadd.f32 %v3795_v17, %v3545_v4 }
0x1786   :  { %v3554_v26 = vadd.f32 %v3546_v27, %v3350_v24  ;;  %v3559_v44 = vsel %vm198_vm1, %v3555_v45, 0.0  ;;  %v3565_v43 = vmul.f32 %v3555_v45, %v3555_v45 }
0x1787   :  { %3560 = vadd.xlane.f32.xlu1 %v3559_v44 }
0x1788   :  { %v3556_v5 = vsel %vm198_vm1, %v3554_v26, 0.0  ;;  %v3564_v6 = vmul.f32 %v3554_v26, %v3554_v26  ;;  %v3569_v7 = vsel %vm198_vm1, %v3565_v43, 0.0 }
0x1789   :  { %3557 = vadd.xlane.f32.xlu0 %v3556_v5 }
0x178a   :  { %v3566_v8 = vsel %vm198_vm1, %v3564_v6, 0.0 }
0x178b   :  { %3570 = vadd.xlane.f32.xlu1 %v3569_v7 }
0x178d   :  { %3567 = vadd.xlane.f32.xlu0 %v3566_v8 }
0x1810   :  { %v3561_v14 = vpop.xlane.xlu1 %3560 }
0x1811   :  { %v3563_v15 = vmul.f32 0.03125, %v3561_v14 }
0x1812   :  { %v3558_v16 = vpop.xlane.xlu0 %3557 }
0x1813   :  { %v3562_v46 = vmul.f32 0.03125, %v3558_v16  ;;  %v3575_v11 = vmul.f32 %v3563_v15, %v3563_v15  ;;  %v3579_v24 = vsub.f32 %v3555_v45, %v3563_v15 }
0x1814   :  { %v3571_v18 = vpop.xlane.xlu1 %3570 }
0x1815   :  { %v3573_v12 = vmul.f32 0.03125, %v3571_v18  ;;  %v3574_v3 = vmul.f32 %v3562_v46, %v3562_v46  ;;  %v3578_v28 = vsub.f32 %v3554_v26, %v3562_v46 }
0x1816   :  { %v3568_v19 = vpop.xlane.xlu0 %3567 }
0x1817   :  { %v3577_v20 = vsub.f32 %v3573_v12, %v3575_v11  ;;  %v3572_v39 = vmul.f32 0.03125, %v3568_v19 }
0x1819   :  { %v3581_v21 = vadd.f32 1e-12, %v3577_v20  ;;  %v3576_v22 = vsub.f32 %v3572_v39, %v3574_v3 }
0x181b   :  { %4310 = vrsqrt.f32 %v3581_v21  ;;  %v3580_v23 = vadd.f32 1e-12, %v3576_v22 }
0x181d   :  { %4312 = vrsqrt.f32 %v3580_v23 }
0x1828   :  { %v4311_v25 = vpop.eup %4310 }
0x1829   :  { %v3585_v29 = vmul.f32 %v4311_v25, %v3579_v24 }
0x182a   :  { %v4313_v33 = vpop.eup %4312 }
0x182b   :  { %v3584_v34 = vmul.f32 %v4313_v33, %v3578_v28  ;;  %v3592_v35 = vmul.f32 %v3798_v31, %v3585_v29 }
0x182d   :  { %v3591_v30 = vmul.f32 %v3798_v31, %v3584_v34  ;;  %v3599_v37 = vadd.f32 %v3799_v36, %v3592_v35 }
0x182f   :  { %v3598_v32 = vadd.f32 %v3799_v36, %v3591_v30 }
0x1831   :  { %4218 = vmatprep.mubr.msk.f32.mxu1 %vm198_vm1, %v3598_v32 }
0x1832   :  { %4219 = vmatmul.mubr.msk.f32.vlgmr.msra.gmra.mxu1 %vm198_vm1, %v3599_v37 }
0x18f2   :  { %v4220_v40 = vpop.f32.mrf.mxu1 }
0x18f3   :  { %v3687_v41 = vadd.f32 %v4220_v40, %v3800_v38 }
0x18f4   :  { %v3681_v42 = vpop.f32.mrf.mxu1 }
0x18f5   :  { %3691 = vst [vmem:[#allocation5 + $0x8] sm:$0xff] %v3687_v41  ;;  %v3682_v49 = vadd.f32 %v3800_v38, %v3681_v42 }
0x18f7   :  { %3690 = vst [vmem:[#allocation5] sm:$0xff] %v3682_v49 }
0x18f8   :  { %4345 = shalt.err (!%p4342_p9)
}
0x18f9   :  { %3703 = dma.vmem_to_hbm [thread:$0]  %s3698_s2, 256, %s4874_s8, [#allocation4], %s4359_s30, %s4359_s30, %s4360_s9  }
0x18fa   :  { %4356 = dma.done.wait [#allocation4], 256  }
0x18fb   :  { %4357 = vsyncadd [#allocation4], 4294967040 }
0x18fc   :  { %3707 = vsyncpa [#allocation3], 1 }
0x18fd   :  { %3708 = vsyncpa [#allocation4], 1 }

</bundles_post_ra>
